<compile_context>
chip_gen: v6e
topology: v6e:2x2x1
jax: 0.10.0
libtpu: 0.0.40
codegen_flags: <defaults>
</compile_context>

<pallas_src>
import functools
import math

import jax
import jax.numpy as jnp
import numpy as np
from jax.experimental import pallas as pl
from jax.experimental.pallas import tpu as pltpu

LN_EPS = 1e-5


def _layernorm(x, w, b):
    # x: (M, D) f32, w/b: (1, D) f32
    mean = jnp.mean(x, axis=-1, keepdims=True)
    var = jnp.mean(jnp.square(x - mean), axis=-1, keepdims=True)
    return (x - mean) * jax.lax.rsqrt(var + LN_EPS) * w + b


def _gelu_exact(x):
    # PyTorch nn.GELU() default = exact erf formulation (f32 math).
    return 0.5 * x * (1.0 + jax.lax.erf(x * 0.7071067811865476))


def encoder_block_kernel(
    x_ref,
    ln1_w_ref, ln1_b_ref,
    wqkv_ref, bqkv_ref,
    wo_ref, bo_ref,
    ln2_w_ref, ln2_b_ref,
    w1_ref, b1_ref,
    w2_ref, b2_ref,
    o_ref,
    qkv_sc, q_sc, k_sc, v_sc, cat_sc,
    *, num_heads,
):
    bt, S, D = x_ref.shape
    H = num_heads
    Dh = D // H
    M = bt * S

    x = x_ref[...].reshape(M, D)                               # (M, D) f32

    # ---- LayerNorm 1 (f32 statistics), cast once at the MXU boundary ----
    h1 = _layernorm(x, ln1_w_ref[...], ln1_b_ref[...]).astype(jnp.bfloat16)

    # ---- fused QKV projection: one lane-dense (M,D)x(D,3D) matmul.
    #      1/sqrt(Dh) is already folded into the Q columns host-side. ----
    qkv = jnp.dot(h1, wqkv_ref[...], preferred_element_type=jnp.float32)
    qkv_sc[...] = (qkv + bqkv_ref[...]).astype(jnp.bfloat16)   # bf16 once

    # ---- relayout to head-major (H, bt, S, Dh) with static VMEM slab copies
    #      (pure data movement; no per-head matmuls, no LHS duplication) ----
    for h in range(H):
        q_sc[h] = qkv_sc[:, pl.ds(h * Dh, Dh)].reshape(bt, S, Dh)
        k_sc[h] = qkv_sc[:, pl.ds(D + h * Dh, Dh)].reshape(bt, S, Dh)
        v_sc[h] = qkv_sc[:, pl.ds(2 * D + h * Dh, Dh)].reshape(bt, S, Dh)

    qh = q_sc[...].reshape(H * bt, S, Dh)                      # free leading merge
    kh = k_sc[...].reshape(H * bt, S, Dh)
    vh = v_sc[...].reshape(H * bt, S, Dh)

    # ---- attention: one batched QK^T and one batched P.V over all
    #      (head, batch-row) pairs; softmax stats in f32 ----
    s = jnp.einsum('bqd,bkd->bqk', qh, kh,
                   preferred_element_type=jnp.float32)         # (H*bt, S, S) f32
    s = s - jnp.max(s, axis=-1, keepdims=True)
    p = jnp.exp(s)
    p = p * pl.reciprocal(jnp.sum(p, axis=-1, keepdims=True), approx=True)
    o = jnp.einsum('bqk,bkd->bqd', p.astype(jnp.bfloat16), vh,
                   preferred_element_type=jnp.float32)         # (H*bt, S, Dh) f32

    # ---- concat heads back to (M, D) bf16 in VMEM, then ONE lane-dense
    #      output projection with full K=D contraction depth ----
    o4 = o.astype(jnp.bfloat16).reshape(H, bt, S, Dh)
    for h in range(H):
        cat_sc[:, pl.ds(h * Dh, Dh)] = o4[h].reshape(M, Dh)
    attn = jnp.dot(cat_sc[...], wo_ref[...],
                   preferred_element_type=jnp.float32) + bo_ref[...]
    x1 = x + attn

    # ---- LayerNorm 2 + FFN (exact GELU) + residual ----
    h2 = _layernorm(x1, ln2_w_ref[...], ln2_b_ref[...]).astype(jnp.bfloat16)
    f = jnp.dot(h2, w1_ref[...], preferred_element_type=jnp.float32) + b1_ref[...]
    f = _gelu_exact(f).astype(jnp.bfloat16)
    f = jnp.dot(f, w2_ref[...], preferred_element_type=jnp.float32) + b2_ref[...]

    o_ref[...] = (x1 + f).reshape(bt, S, D).astype(o_ref.dtype)


def _choose_block_b(B, S, target_m=512):
    """Largest divisor of B with block_b*S <= target_m while keeping >=2 grid
    steps (so the 'parallel' axis can shard across v7x's two TensorCores)."""
    limit = B if B < 2 else B // 2
    best = 1
    for c in range(1, limit + 1):
        if B % c == 0 and c * S <= max(target_m, S):
            best = c
    return best


def _physical_vmem_bytes():
    try:
        return int(pltpu.get_tpu_info().vmem_capacity_bytes)
    except Exception:
        return 64 << 20   # conservative (v7x per-TC) if the query is unavailable


def _vmem_limit_bytes(kparams, block_b, S, D, H, single_buffer_weights):
    M = block_b * S
    wmul = 1 if single_buffer_weights else 2
    weight_bytes = wmul * sum(int(np.prod(p.shape)) * p.dtype.itemsize
                              for p in kparams)
    act = (
        2 * 2 * M * D * 4                   # x in / out blocks (double buffered)
        + M * 3 * D * (4 + 2)               # qkv f32 result + bf16 scratch
        + 3 * M * D * 2                     # head-major q/k/v scratch (bf16)
        + H * block_b * S * S * (4 + 2)     # scores f32 + probs bf16
        + M * D * (4 + 2)                   # attn out f32 + concat bf16
        + M * 4 * D * (4 + 2)               # FFN hidden f32 + bf16
        + 6 * M * D * 4                     # LN / residual temporaries
    )
    est = int((weight_bytes + act) * 1.3) + (2 << 20)
    cap = int(_physical_vmem_bytes() * 0.85)   # leave compiler scratch headroom
    return min(max(est, 32 << 20), cap)


def transformer_encoder_block(x, kparams, num_heads, *, block_b=None,
                              single_buffer_weights=True):
    """x: (B, S, D) float32 -> (B, S, D) float32."""
    B, S, D = x.shape
    H = num_heads
    assert D % H == 0
    Dh = D // H

    if block_b is None:
        block_b = _choose_block_b(B, S)
    assert B % block_b == 0, "batch must be divisible by block_b"

    def w_spec(p):
        zeros = (0,) * p.ndim
        idx = lambda i, _z=zeros: _z
        if single_buffer_weights:
            # constant index map -> never re-fetched; single buffer halves
            # the weight VMEM footprint (important on v7x's 64 MiB budget).
            return pl.BlockSpec(p.shape, idx, pipeline_mode=pl.Buffered(1))
        return pl.BlockSpec(p.shape, idx)

    in_specs = [pl.BlockSpec((block_b, S, D), lambda i: (i, 0, 0))]
    in_specs += [w_spec(p) for p in kparams]
    out_specs = pl.BlockSpec((block_b, S, D), lambda i: (i, 0, 0))

    kernel = functools.partial(encoder_block_kernel, num_heads=H)

    return pl.pallas_call(
        kernel,
        out_shape=jax.ShapeDtypeStruct((B, S, D), x.dtype),
        grid_spec=pltpu.PrefetchScalarGridSpec(
            num_scalar_prefetch=0,
            grid=(B // block_b,),
            in_specs=in_specs,
            out_specs=out_specs,
            scratch_shapes=[
                pltpu.VMEM((block_b * S, 3 * D), jnp.bfloat16),   # qkv (bf16)
                pltpu.VMEM((H, block_b, S, Dh), jnp.bfloat16),    # q head-major
                pltpu.VMEM((H, block_b, S, Dh), jnp.bfloat16),    # k head-major
                pltpu.VMEM((H, block_b, S, Dh), jnp.bfloat16),    # v head-major
                pltpu.VMEM((block_b * S, D), jnp.bfloat16),       # concat heads
            ],
        ),
        compiler_params=pltpu.CompilerParams(
            dimension_semantics=("parallel",),
            vmem_limit_bytes=_vmem_limit_bytes(
                kparams, block_b, S, D, H, single_buffer_weights),
        ),
    )(x, *kparams)


def prepare_kernel_params(params, num_heads, compute_dtype=jnp.bfloat16):
    """Host-side: fold 1/sqrt(Dh) into the Q third of the packed QKV weight and
    bias, cast weights to bf16 and biases / LN params to f32."""
    (ln1_w, ln1_b, wqkv, bqkv, wo, bo, ln2_w, ln2_b, w1, b1, w2, b2) = params
    D = wo.shape[0]
    assert D % num_heads == 0
    Dh = D // num_heads
    scale = 1.0 / math.sqrt(Dh)

    f32 = jnp.float32
    scale_vec = jnp.concatenate(
        [jnp.full((D,), scale, f32), jnp.ones((2 * D,), f32)])
    wqkv_s = (wqkv * scale_vec[None, :]).astype(compute_dtype)   # (D, 3D) bf16
    bqkv_s = (bqkv * scale_vec[None, :]).astype(f32)             # (1, 3D) f32

    return (ln1_w.astype(f32), ln1_b.astype(f32),
            wqkv_s, bqkv_s,
            wo.astype(compute_dtype), bo.astype(f32),
            ln2_w.astype(f32), ln2_b.astype(f32),
            w1.astype(compute_dtype), b1.astype(f32),
            w2.astype(compute_dtype), b2.astype(f32))


def reference_block(x, params, num_heads):
    """Pure-JAX f32 reference matching PyTorch semantics."""
    (ln1_w, ln1_b, wqkv, bqkv, wo, bo, ln2_w, ln2_b, w1, b1, w2, b2) = params
    B, S, D = x.shape
    Dh = D // num_heads

    def ln(v, w, b):
        m = jnp.mean(v, axis=-1, keepdims=True)
        var = jnp.mean(jnp.square(v - m), axis=-1, keepdims=True)
        return (v - m) / jnp.sqrt(var + LN_EPS) * w + b

    h = ln(x, ln1_w, ln1_b)
    qkv = h @ wqkv + bqkv
    q, k, v = qkv[..., :D], qkv[..., D:2 * D], qkv[..., 2 * D:]
    q = q.reshape(B, S, num_heads, Dh).transpose(0, 2, 1, 3) / np.sqrt(Dh)
    k = k.reshape(B, S, num_heads, Dh).transpose(0, 2, 1, 3)
    v = v.reshape(B, S, num_heads, Dh).transpose(0, 2, 1, 3)
    s = jnp.einsum("bhqd,bhkd->bhqk", q, k)
    p = jax.nn.softmax(s, axis=-1)
    o = jnp.einsum("bhqk,bhkd->bhqd", p, v).transpose(0, 2, 1, 3).reshape(B, S, D)
    x1 = x + o @ wo + bo
    h2 = ln(x1, ln2_w, ln2_b)
    f = jax.nn.gelu(h2 @ w1 + b1, approximate=False) @ w2 + b2
    return x1 + f


def init_params(key, dim):
    ks = jax.random.split(key, 8)
    scale = 0.02
    ln1_w = jnp.ones((1, dim), jnp.float32)
    ln1_b = jnp.zeros((1, dim), jnp.float32)
    ln2_w = jnp.ones((1, dim), jnp.float32)
    ln2_b = jnp.zeros((1, dim), jnp.float32)
    # (in, out) layout = pre-transposed torch weights
    wqkv = scale * jax.random.normal(ks[0], (dim, 3 * dim), jnp.float32)
    bqkv = scale * jax.random.normal(ks[1], (1, 3 * dim), jnp.float32)
    wo = scale * jax.random.normal(ks[2], (dim, dim), jnp.float32)
    bo = scale * jax.random.normal(ks[3], (1, dim), jnp.float32)
    w1 = scale * jax.random.normal(ks[4], (dim, 4 * dim), jnp.float32)
    b1 = scale * jax.random.normal(ks[5], (1, 4 * dim), jnp.float32)
    w2 = scale * jax.random.normal(ks[6], (4 * dim, dim), jnp.float32)
    b2 = scale * jax.random.normal(ks[7], (1, dim), jnp.float32)
    return (ln1_w, ln1_b, wqkv, bqkv, wo, bo, ln2_w, ln2_b, w1, b1, w2, b2)


if __name__ == "__main__":
    B, S, D, H = 2, 8, 32, 4   # batch, seq, embed dim, heads (head_dim = 8)
    key = jax.random.PRNGKey(0)
    kx, kp = jax.random.split(key)
    x = jax.random.normal(kx, (B, S, D), jnp.float32)
    params = init_params(kp, D)
    kparams = prepare_kernel_params(params, H)

    try:
        out = jax.block_until_ready(
            transformer_encoder_block(x, kparams, H, single_buffer_weights=True))
    except Exception:
        # Fallback if this JAX build rejects pipeline_mode=pl.Buffered(1).
        out = jax.block_until_ready(
            transformer_encoder_block(x, kparams, H, single_buffer_weights=False))

    ref = reference_block(x, params, H)
    # bf16 matmul inputs + approx reciprocal -> relaxed tolerance vs f32 ref.
    np.testing.assert_allclose(np.asarray(out), np.asarray(ref), rtol=2e-2, atol=2e-2)

    print("KERNEL_OK")
</pallas_src>

<mosaic_0001>
module attributes {stable_mosaic.version = 11 : i64} {
  func.func @encoder_block_kernel(%arg0: i32, %arg1: memref<1x8x32xf32, #tpu.memory_space<vmem>>, %arg2: memref<1x32xf32, #tpu.memory_space<vmem>>, %arg3: memref<1x32xf32, #tpu.memory_space<vmem>>, %arg4: memref<32x96xbf16, #tpu.memory_space<vmem>>, %arg5: memref<1x96xf32, #tpu.memory_space<vmem>>, %arg6: memref<32x32xbf16, #tpu.memory_space<vmem>>, %arg7: memref<1x32xf32, #tpu.memory_space<vmem>>, %arg8: memref<1x32xf32, #tpu.memory_space<vmem>>, %arg9: memref<1x32xf32, #tpu.memory_space<vmem>>, %arg10: memref<32x128xbf16, #tpu.memory_space<vmem>>, %arg11: memref<1x128xf32, #tpu.memory_space<vmem>>, %arg12: memref<128x32xbf16, #tpu.memory_space<vmem>>, %arg13: memref<1x32xf32, #tpu.memory_space<vmem>>, %arg14: memref<1x8x32xf32, #tpu.memory_space<vmem>>, %arg15: memref<8x96xbf16, #tpu.memory_space<vmem>>, %arg16: memref<4x1x8x8xbf16, #tpu.memory_space<vmem>>, %arg17: memref<4x1x8x8xbf16, #tpu.memory_space<vmem>>, %arg18: memref<4x1x8x8xbf16, #tpu.memory_space<vmem>>, %arg19: memref<8x32xbf16, #tpu.memory_space<vmem>>) attributes {dimension_semantics = [#tpu.dimension_semantics<parallel>], iteration_bounds = array<i64: 2>, scalar_prefetch = 0 : i64, scratch_operands = 5 : i64, tpu.core_type = #tpu.core_type<tc>, window_params = [{transform_indices = @transform_0, window_bounds = array<i64: 1, 8, 32>}, {pipeline_mode = #tpu.pipeline_mode<synchronous>, transform_indices = @transform_1, window_bounds = array<i64: 1, 32>}, {pipeline_mode = #tpu.pipeline_mode<synchronous>, transform_indices = @transform_2, window_bounds = array<i64: 1, 32>}, {pipeline_mode = #tpu.pipeline_mode<synchronous>, transform_indices = @transform_3, window_bounds = array<i64: 32, 96>}, {pipeline_mode = #tpu.pipeline_mode<synchronous>, transform_indices = @transform_4, window_bounds = array<i64: 1, 96>}, {pipeline_mode = #tpu.pipeline_mode<synchronous>, transform_indices = @transform_5, window_bounds = array<i64: 32, 32>}, {pipeline_mode = #tpu.pipeline_mode<synchronous>, transform_indices = @transform_6, window_bounds = array<i64: 1, 32>}, {pipeline_mode = #tpu.pipeline_mode<synchronous>, transform_indices = @transform_7, window_bounds = array<i64: 1, 32>}, {pipeline_mode = #tpu.pipeline_mode<synchronous>, transform_indices = @transform_8, window_bounds = array<i64: 1, 32>}, {pipeline_mode = #tpu.pipeline_mode<synchronous>, transform_indices = @transform_9, window_bounds = array<i64: 32, 128>}, {pipeline_mode = #tpu.pipeline_mode<synchronous>, transform_indices = @transform_10, window_bounds = array<i64: 1, 128>}, {pipeline_mode = #tpu.pipeline_mode<synchronous>, transform_indices = @transform_11, window_bounds = array<i64: 128, 32>}, {pipeline_mode = #tpu.pipeline_mode<synchronous>, transform_indices = @transform_12, window_bounds = array<i64: 1, 32>}, {transform_indices = @transform_13, window_bounds = array<i64: 1, 8, 32>}]} {
    %c0 = arith.constant 0 : index
    %c0_0 = arith.constant 0 : index
    %c0_1 = arith.constant 0 : index
    %0 = vector.load %arg1[%c0, %c0_0, %c0_1] : memref<1x8x32xf32, #tpu.memory_space<vmem>>, vector<1x8x32xf32>
    %1 = vector.shape_cast %0 : vector<1x8x32xf32> to vector<8x32xf32>
    %c0_2 = arith.constant 0 : index
    %c0_3 = arith.constant 0 : index
    %2 = vector.load %arg2[%c0_2, %c0_3] : memref<1x32xf32, #tpu.memory_space<vmem>>, vector<1x32xf32>
    %c0_4 = arith.constant 0 : index
    %c0_5 = arith.constant 0 : index
    %3 = vector.load %arg3[%c0_4, %c0_5] : memref<1x32xf32, #tpu.memory_space<vmem>>, vector<1x32xf32>
    %cst = arith.constant dense<0.000000e+00> : vector<8xf32>
    %4 = vector.multi_reduction <add>, %1, %cst [1] : vector<8x32xf32> to vector<8xf32>
    %5 = vector.shape_cast %4 : vector<8xf32> to vector<8x1xf32>
    %cst_6 = arith.constant 3.200000e+01 : f32
    %6 = vector.broadcast %cst_6 : f32 to vector<8x1xf32>
    %7 = arith.divf %5, %6 : vector<8x1xf32>
    %8 = vector.broadcast %7 : vector<8x1xf32> to vector<8x32xf32>
    %9 = arith.subf %1, %8 : vector<8x32xf32>
    %10 = arith.mulf %9, %9 : vector<8x32xf32>
    %cst_7 = arith.constant dense<0.000000e+00> : vector<8xf32>
    %11 = vector.multi_reduction <add>, %10, %cst_7 [1] : vector<8x32xf32> to vector<8xf32>
    %12 = vector.shape_cast %11 : vector<8xf32> to vector<8x1xf32>
    %cst_8 = arith.constant 3.200000e+01 : f32
    %13 = vector.broadcast %cst_8 : f32 to vector<8x1xf32>
    %14 = arith.divf %12, %13 : vector<8x1xf32>
    %15 = vector.broadcast %7 : vector<8x1xf32> to vector<8x32xf32>
    %16 = arith.subf %1, %15 : vector<8x32xf32>
    %cst_9 = arith.constant 9.99999974E-6 : f32
    %17 = vector.broadcast %cst_9 : f32 to vector<8x1xf32>
    %18 = arith.addf %14, %17 : vector<8x1xf32>
    %19 = math.rsqrt %18 : vector<8x1xf32>
    %20 = vector.broadcast %19 : vector<8x1xf32> to vector<8x32xf32>
    %21 = arith.mulf %16, %20 : vector<8x32xf32>
    %22 = vector.broadcast %2 : vector<1x32xf32> to vector<8x32xf32>
    %23 = arith.mulf %21, %22 : vector<8x32xf32>
    %24 = vector.broadcast %3 : vector<1x32xf32> to vector<8x32xf32>
    %25 = arith.addf %23, %24 : vector<8x32xf32>
    %26 = arith.truncf %25 : vector<8x32xf32> to vector<8x32xbf16>
    %c0_10 = arith.constant 0 : index
    %c0_11 = arith.constant 0 : index
    %27 = vector.load %arg4[%c0_10, %c0_11] : memref<32x96xbf16, #tpu.memory_space<vmem>>, vector<32x96xbf16>
    %cst_12 = arith.constant dense<0.000000e+00> : vector<8x96xf32>
    %28 = tpu.matmul %26, %27, %cst_12 {dimension_numbers = #tpu.dot_dimension_numbers<[1], [0], [0], [1], [0, 0, 1, 1], [], []>} : vector<8x32xbf16>, vector<32x96xbf16>, vector<8x96xf32> -> vector<8x96xf32>
    %c0_13 = arith.constant 0 : index
    %c0_14 = arith.constant 0 : index
    %29 = vector.load %arg5[%c0_13, %c0_14] : memref<1x96xf32, #tpu.memory_space<vmem>>, vector<1x96xf32>
    %30 = vector.broadcast %29 : vector<1x96xf32> to vector<8x96xf32>
    %31 = arith.addf %28, %30 : vector<8x96xf32>
    %32 = arith.truncf %31 : vector<8x96xf32> to vector<8x96xbf16>
    %c0_15 = arith.constant 0 : index
    %c0_16 = arith.constant 0 : index
    %33 = vector.load %arg15[%c0_15, %c0_16] : memref<8x96xbf16, #tpu.memory_space<vmem>>, vector<8x96xbf16>
    tpu.vector_store %arg15[%c0_15, %c0_16], %32 {strides = array<i32>} : memref<8x96xbf16, #tpu.memory_space<vmem>>, vector<8x96xbf16>,
    %c0_17 = arith.constant 0 : index
    %c0_18 = arith.constant 0 : index
    %34 = vector.load %arg15[%c0_17, %c0_18] : memref<8x96xbf16, #tpu.memory_space<vmem>>, vector<8x8xbf16>
    %35 = vector.shape_cast %34 : vector<8x8xbf16> to vector<1x8x8xbf16>
    %c0_19 = arith.constant 0 : index
    %c0_20 = arith.constant 0 : index
    %c0_21 = arith.constant 0 : index
    %c0_22 = arith.constant 0 : index
    %36 = vector.load %arg16[%c0_19, %c0_20, %c0_21, %c0_22] : memref<4x1x8x8xbf16, #tpu.memory_space<vmem>>, vector<1x1x8x8xbf16>
    %37 = vector.shape_cast %36 : vector<1x1x8x8xbf16> to vector<1x8x8xbf16>
    %38 = vector.shape_cast %35 : vector<1x8x8xbf16> to vector<1x1x8x8xbf16>
    tpu.vector_store %arg16[%c0_19, %c0_20, %c0_21, %c0_22], %38 {strides = array<i32>} : memref<4x1x8x8xbf16, #tpu.memory_space<vmem>>, vector<1x1x8x8xbf16>,
    %c0_23 = arith.constant 0 : index
    %c32 = arith.constant 32 : index
    %39 = vector.load %arg15[%c0_23, %c32] : memref<8x96xbf16, #tpu.memory_space<vmem>>, vector<8x8xbf16>
    %40 = vector.shape_cast %39 : vector<8x8xbf16> to vector<1x8x8xbf16>
    %c0_24 = arith.constant 0 : index
    %c0_25 = arith.constant 0 : index
    %c0_26 = arith.constant 0 : index
    %c0_27 = arith.constant 0 : index
    %41 = vector.load %arg17[%c0_24, %c0_25, %c0_26, %c0_27] : memref<4x1x8x8xbf16, #tpu.memory_space<vmem>>, vector<1x1x8x8xbf16>
    %42 = vector.shape_cast %41 : vector<1x1x8x8xbf16> to vector<1x8x8xbf16>
    %43 = vector.shape_cast %40 : vector<1x8x8xbf16> to vector<1x1x8x8xbf16>
    tpu.vector_store %arg17[%c0_24, %c0_25, %c0_26, %c0_27], %43 {strides = array<i32>} : memref<4x1x8x8xbf16, #tpu.memory_space<vmem>>, vector<1x1x8x8xbf16>,
    %c0_28 = arith.constant 0 : index
    %c64 = arith.constant 64 : index
    %44 = vector.load %arg15[%c0_28, %c64] : memref<8x96xbf16, #tpu.memory_space<vmem>>, vector<8x8xbf16>
    %45 = vector.shape_cast %44 : vector<8x8xbf16> to vector<1x8x8xbf16>
    %c0_29 = arith.constant 0 : index
    %c0_30 = arith.constant 0 : index
    %c0_31 = arith.constant 0 : index
    %c0_32 = arith.constant 0 : index
    %46 = vector.load %arg18[%c0_29, %c0_30, %c0_31, %c0_32] : memref<4x1x8x8xbf16, #tpu.memory_space<vmem>>, vector<1x1x8x8xbf16>
    %47 = vector.shape_cast %46 : vector<1x1x8x8xbf16> to vector<1x8x8xbf16>
    %48 = vector.shape_cast %45 : vector<1x8x8xbf16> to vector<1x1x8x8xbf16>
    tpu.vector_store %arg18[%c0_29, %c0_30, %c0_31, %c0_32], %48 {strides = array<i32>} : memref<4x1x8x8xbf16, #tpu.memory_space<vmem>>, vector<1x1x8x8xbf16>,
    %c0_33 = arith.constant 0 : index
    %c8 = arith.constant 8 : index
    %49 = vector.load %arg15[%c0_33, %c8] : memref<8x96xbf16, #tpu.memory_space<vmem>>, vector<8x8xbf16>
    %50 = vector.shape_cast %49 : vector<8x8xbf16> to vector<1x8x8xbf16>
    %c1 = arith.constant 1 : index
    %c0_34 = arith.constant 0 : index
    %c0_35 = arith.constant 0 : index
    %c0_36 = arith.constant 0 : index
    %51 = vector.load %arg16[%c1, %c0_34, %c0_35, %c0_36] : memref<4x1x8x8xbf16, #tpu.memory_space<vmem>>, vector<1x1x8x8xbf16>
    %52 = vector.shape_cast %51 : vector<1x1x8x8xbf16> to vector<1x8x8xbf16>
    %53 = vector.shape_cast %50 : vector<1x8x8xbf16> to vector<1x1x8x8xbf16>
    tpu.vector_store %arg16[%c1, %c0_34, %c0_35, %c0_36], %53 {strides = array<i32>} : memref<4x1x8x8xbf16, #tpu.memory_space<vmem>>, vector<1x1x8x8xbf16>,
    %c0_37 = arith.constant 0 : index
    %c40 = arith.constant 40 : index
    %54 = vector.load %arg15[%c0_37, %c40] : memref<8x96xbf16, #tpu.memory_space<vmem>>, vector<8x8xbf16>
    %55 = vector.shape_cast %54 : vector<8x8xbf16> to vector<1x8x8xbf16>
    %c1_38 = arith.constant 1 : index
    %c0_39 = arith.constant 0 : index
    %c0_40 = arith.constant 0 : index
    %c0_41 = arith.constant 0 : index
    %56 = vector.load %arg17[%c1_38, %c0_39, %c0_40, %c0_41] : memref<4x1x8x8xbf16, #tpu.memory_space<vmem>>, vector<1x1x8x8xbf16>
    %57 = vector.shape_cast %56 : vector<1x1x8x8xbf16> to vector<1x8x8xbf16>
    %58 = vector.shape_cast %55 : vector<1x8x8xbf16> to vector<1x1x8x8xbf16>
    tpu.vector_store %arg17[%c1_38, %c0_39, %c0_40, %c0_41], %58 {strides = array<i32>} : memref<4x1x8x8xbf16, #tpu.memory_space<vmem>>, vector<1x1x8x8xbf16>,
    %c0_42 = arith.constant 0 : index
    %c72 = arith.constant 72 : index
    %59 = vector.load %arg15[%c0_42, %c72] : memref<8x96xbf16, #tpu.memory_space<vmem>>, vector<8x8xbf16>
    %60 = vector.shape_cast %59 : vector<8x8xbf16> to vector<1x8x8xbf16>
    %c1_43 = arith.constant 1 : index
    %c0_44 = arith.constant 0 : index
    %c0_45 = arith.constant 0 : index
    %c0_46 = arith.constant 0 : index
    %61 = vector.load %arg18[%c1_43, %c0_44, %c0_45, %c0_46] : memref<4x1x8x8xbf16, #tpu.memory_space<vmem>>, vector<1x1x8x8xbf16>
    %62 = vector.shape_cast %61 : vector<1x1x8x8xbf16> to vector<1x8x8xbf16>
    %63 = vector.shape_cast %60 : vector<1x8x8xbf16> to vector<1x1x8x8xbf16>
    tpu.vector_store %arg18[%c1_43, %c0_44, %c0_45, %c0_46], %63 {strides = array<i32>} : memref<4x1x8x8xbf16, #tpu.memory_space<vmem>>, vector<1x1x8x8xbf16>,
    %c0_47 = arith.constant 0 : index
    %c16 = arith.constant 16 : index
    %64 = vector.load %arg15[%c0_47, %c16] : memref<8x96xbf16, #tpu.memory_space<vmem>>, vector<8x8xbf16>
    %65 = vector.shape_cast %64 : vector<8x8xbf16> to vector<1x8x8xbf16>
    %c2 = arith.constant 2 : index
    %c0_48 = arith.constant 0 : index
    %c0_49 = arith.constant 0 : index
    %c0_50 = arith.constant 0 : index
    %66 = vector.load %arg16[%c2, %c0_48, %c0_49, %c0_50] : memref<4x1x8x8xbf16, #tpu.memory_space<vmem>>, vector<1x1x8x8xbf16>
    %67 = vector.shape_cast %66 : vector<1x1x8x8xbf16> to vector<1x8x8xbf16>
    %68 = vector.shape_cast %65 : vector<1x8x8xbf16> to vector<1x1x8x8xbf16>
    tpu.vector_store %arg16[%c2, %c0_48, %c0_49, %c0_50], %68 {strides = array<i32>} : memref<4x1x8x8xbf16, #tpu.memory_space<vmem>>, vector<1x1x8x8xbf16>,
    %c0_51 = arith.constant 0 : index
    %c48 = arith.constant 48 : index
    %69 = vector.load %arg15[%c0_51, %c48] : memref<8x96xbf16, #tpu.memory_space<vmem>>, vector<8x8xbf16>
    %70 = vector.shape_cast %69 : vector<8x8xbf16> to vector<1x8x8xbf16>
    %c2_52 = arith.constant 2 : index
    %c0_53 = arith.constant 0 : index
    %c0_54 = arith.constant 0 : index
    %c0_55 = arith.constant 0 : index
    %71 = vector.load %arg17[%c2_52, %c0_53, %c0_54, %c0_55] : memref<4x1x8x8xbf16, #tpu.memory_space<vmem>>, vector<1x1x8x8xbf16>
    %72 = vector.shape_cast %71 : vector<1x1x8x8xbf16> to vector<1x8x8xbf16>
    %73 = vector.shape_cast %70 : vector<1x8x8xbf16> to vector<1x1x8x8xbf16>
    tpu.vector_store %arg17[%c2_52, %c0_53, %c0_54, %c0_55], %73 {strides = array<i32>} : memref<4x1x8x8xbf16, #tpu.memory_space<vmem>>, vector<1x1x8x8xbf16>,
    %c0_56 = arith.constant 0 : index
    %c80 = arith.constant 80 : index
    %74 = vector.load %arg15[%c0_56, %c80] : memref<8x96xbf16, #tpu.memory_space<vmem>>, vector<8x8xbf16>
    %75 = vector.shape_cast %74 : vector<8x8xbf16> to vector<1x8x8xbf16>
    %c2_57 = arith.constant 2 : index
    %c0_58 = arith.constant 0 : index
    %c0_59 = arith.constant 0 : index
    %c0_60 = arith.constant 0 : index
    %76 = vector.load %arg18[%c2_57, %c0_58, %c0_59, %c0_60] : memref<4x1x8x8xbf16, #tpu.memory_space<vmem>>, vector<1x1x8x8xbf16>
    %77 = vector.shape_cast %76 : vector<1x1x8x8xbf16> to vector<1x8x8xbf16>
    %78 = vector.shape_cast %75 : vector<1x8x8xbf16> to vector<1x1x8x8xbf16>
    tpu.vector_store %arg18[%c2_57, %c0_58, %c0_59, %c0_60], %78 {strides = array<i32>} : memref<4x1x8x8xbf16, #tpu.memory_space<vmem>>, vector<1x1x8x8xbf16>,
    %c0_61 = arith.constant 0 : index
    %c24 = arith.constant 24 : index
    %79 = vector.load %arg15[%c0_61, %c24] : memref<8x96xbf16, #tpu.memory_space<vmem>>, vector<8x8xbf16>
    %80 = vector.shape_cast %79 : vector<8x8xbf16> to vector<1x8x8xbf16>
    %c3 = arith.constant 3 : index
    %c0_62 = arith.constant 0 : index
    %c0_63 = arith.constant 0 : index
    %c0_64 = arith.constant 0 : index
    %81 = vector.load %arg16[%c3, %c0_62, %c0_63, %c0_64] : memref<4x1x8x8xbf16, #tpu.memory_space<vmem>>, vector<1x1x8x8xbf16>
    %82 = vector.shape_cast %81 : vector<1x1x8x8xbf16> to vector<1x8x8xbf16>
    %83 = vector.shape_cast %80 : vector<1x8x8xbf16> to vector<1x1x8x8xbf16>
    tpu.vector_store %arg16[%c3, %c0_62, %c0_63, %c0_64], %83 {strides = array<i32>} : memref<4x1x8x8xbf16, #tpu.memory_space<vmem>>, vector<1x1x8x8xbf16>,
    %c0_65 = arith.constant 0 : index
    %c56 = arith.constant 56 : index
    %84 = vector.load %arg15[%c0_65, %c56] : memref<8x96xbf16, #tpu.memory_space<vmem>>, vector<8x8xbf16>
    %85 = vector.shape_cast %84 : vector<8x8xbf16> to vector<1x8x8xbf16>
    %c3_66 = arith.constant 3 : index
    %c0_67 = arith.constant 0 : index
    %c0_68 = arith.constant 0 : index
    %c0_69 = arith.constant 0 : index
    %86 = vector.load %arg17[%c3_66, %c0_67, %c0_68, %c0_69] : memref<4x1x8x8xbf16, #tpu.memory_space<vmem>>, vector<1x1x8x8xbf16>
    %87 = vector.shape_cast %86 : vector<1x1x8x8xbf16> to vector<1x8x8xbf16>
    %88 = vector.shape_cast %85 : vector<1x8x8xbf16> to vector<1x1x8x8xbf16>
    tpu.vector_store %arg17[%c3_66, %c0_67, %c0_68, %c0_69], %88 {strides = array<i32>} : memref<4x1x8x8xbf16, #tpu.memory_space<vmem>>, vector<1x1x8x8xbf16>,
    %c0_70 = arith.constant 0 : index
    %c88 = arith.constant 88 : index
    %89 = vector.load %arg15[%c0_70, %c88] : memref<8x96xbf16, #tpu.memory_space<vmem>>, vector<8x8xbf16>
    %90 = vector.shape_cast %89 : vector<8x8xbf16> to vector<1x8x8xbf16>
    %c3_71 = arith.constant 3 : index
    %c0_72 = arith.constant 0 : index
    %c0_73 = arith.constant 0 : index
    %c0_74 = arith.constant 0 : index
    %91 = vector.load %arg18[%c3_71, %c0_72, %c0_73, %c0_74] : memref<4x1x8x8xbf16, #tpu.memory_space<vmem>>, vector<1x1x8x8xbf16>
    %92 = vector.shape_cast %91 : vector<1x1x8x8xbf16> to vector<1x8x8xbf16>
    %93 = vector.shape_cast %90 : vector<1x8x8xbf16> to vector<1x1x8x8xbf16>
    tpu.vector_store %arg18[%c3_71, %c0_72, %c0_73, %c0_74], %93 {strides = array<i32>} : memref<4x1x8x8xbf16, #tpu.memory_space<vmem>>, vector<1x1x8x8xbf16>,
    %c0_75 = arith.constant 0 : index
    %c0_76 = arith.constant 0 : index
    %c0_77 = arith.constant 0 : index
    %c0_78 = arith.constant 0 : index
    %94 = vector.load %arg16[%c0_75, %c0_76, %c0_77, %c0_78] : memref<4x1x8x8xbf16, #tpu.memory_space<vmem>>, vector<4x1x8x8xbf16>
    %95 = vector.shape_cast %94 : vector<4x1x8x8xbf16> to vector<4x8x8xbf16>
    %c0_79 = arith.constant 0 : index
    %c0_80 = arith.constant 0 : index
    %c0_81 = arith.constant 0 : index
    %c0_82 = arith.constant 0 : index
    %96 = vector.load %arg17[%c0_79, %c0_80, %c0_81, %c0_82] : memref<4x1x8x8xbf16, #tpu.memory_space<vmem>>, vector<4x1x8x8xbf16>
    %97 = vector.shape_cast %96 : vector<4x1x8x8xbf16> to vector<4x8x8xbf16>
    %c0_83 = arith.constant 0 : index
    %c0_84 = arith.constant 0 : index
    %c0_85 = arith.constant 0 : index
    %c0_86 = arith.constant 0 : index
    %98 = vector.load %arg18[%c0_83, %c0_84, %c0_85, %c0_86] : memref<4x1x8x8xbf16, #tpu.memory_space<vmem>>, vector<4x1x8x8xbf16>
    %99 = vector.shape_cast %98 : vector<4x1x8x8xbf16> to vector<4x8x8xbf16>
    "tpu.trace_start"() <{level = 10 : i32, message = "bqd,bkd->bqk"}> : () -> ()
    %cst_87 = arith.constant dense<0.000000e+00> : vector<4x8x8xf32>
    %100 = tpu.matmul %95, %97, %cst_87 {dimension_numbers = #tpu.dot_dimension_numbers<[2], [2], [1], [1], [0, 0, 0, 1, 1, 1], [0], [0]>} : vector<4x8x8xbf16>, vector<4x8x8xbf16>, vector<4x8x8xf32> -> vector<4x8x8xf32>
    "tpu.trace_stop"() : () -> ()
    %cst_88 = arith.constant dense<0xFF800000> : vector<4x8xf32>
    %101 = vector.multi_reduction <maximumf>, %100, %cst_88 [2] : vector<4x8x8xf32> to vector<4x8xf32>
    %102 = vector.shape_cast %101 : vector<4x8xf32> to vector<4x8x1xf32>
    %103 = vector.broadcast %102 : vector<4x8x1xf32> to vector<4x8x8xf32>
    %104 = arith.subf %100, %103 : vector<4x8x8xf32>
    %105 = math.exp %104 : vector<4x8x8xf32>
    %cst_89 = arith.constant dense<0.000000e+00> : vector<4x8xf32>
    %106 = vector.multi_reduction <add>, %105, %cst_89 [2] : vector<4x8x8xf32> to vector<4x8xf32>
    %107 = vector.shape_cast %106 : vector<4x8xf32> to vector<4x8x1xf32>
    %108 = tpu.reciprocal %107 {approx = true} : vector<4x8x1xf32> -> vector<4x8x1xf32>
    %109 = vector.broadcast %108 : vector<4x8x1xf32> to vector<4x8x8xf32>
    %110 = arith.mulf %105, %109 : vector<4x8x8xf32>
    %111 = arith.truncf %110 : vector<4x8x8xf32> to vector<4x8x8xbf16>
    "tpu.trace_start"() <{level = 10 : i32, message = "bqk,bkd->bqd"}> : () -> ()
    %cst_90 = arith.constant dense<0.000000e+00> : vector<4x8x8xf32>
    %112 = tpu.matmul %111, %99, %cst_90 {dimension_numbers = #tpu.dot_dimension_numbers<[2], [1], [1], [2], [0, 0, 0, 1, 1, 2], [0], [0]>} : vector<4x8x8xbf16>, vector<4x8x8xbf16>, vector<4x8x8xf32> -> vector<4x8x8xf32>
    "tpu.trace_stop"() : () -> ()
    %113 = arith.truncf %112 : vector<4x8x8xf32> to vector<4x8x8xbf16>
    %114 = vector.shape_cast %113 : vector<4x8x8xbf16> to vector<4x1x8x8xbf16>
    %115 = vector.extract_strided_slice %114 {offsets = [0, 0, 0, 0], sizes = [1, 1, 8, 8], strides = [1, 1, 1, 1]} : vector<4x1x8x8xbf16> to vector<1x1x8x8xbf16>
    %116 = vector.shape_cast %115 : vector<1x1x8x8xbf16> to vector<1x8x8xbf16>
    %117 = vector.shape_cast %116 : vector<1x8x8xbf16> to vector<8x8xbf16>
    %c0_91 = arith.constant 0 : index
    %c0_92 = arith.constant 0 : index
    %118 = vector.load %arg19[%c0_91, %c0_92] : memref<8x32xbf16, #tpu.memory_space<vmem>>, vector<8x8xbf16>
    tpu.vector_store %arg19[%c0_91, %c0_92], %117 {strides = array<i32>} : memref<8x32xbf16, #tpu.memory_space<vmem>>, vector<8x8xbf16>,
    %119 = vector.extract_strided_slice %114 {offsets = [1, 0, 0, 0], sizes = [1, 1, 8, 8], strides = [1, 1, 1, 1]} : vector<4x1x8x8xbf16> to vector<1x1x8x8xbf16>
    %120 = vector.shape_cast %119 : vector<1x1x8x8xbf16> to vector<1x8x8xbf16>
    %121 = vector.shape_cast %120 : vector<1x8x8xbf16> to vector<8x8xbf16>
    %c0_93 = arith.constant 0 : index
    %c8_94 = arith.constant 8 : index
    %122 = vector.load %arg19[%c0_93, %c8_94] : memref<8x32xbf16, #tpu.memory_space<vmem>>, vector<8x8xbf16>
    tpu.vector_store %arg19[%c0_93, %c8_94], %121 {strides = array<i32>} : memref<8x32xbf16, #tpu.memory_space<vmem>>, vector<8x8xbf16>,
    %123 = vector.extract_strided_slice %114 {offsets = [2, 0, 0, 0], sizes = [1, 1, 8, 8], strides = [1, 1, 1, 1]} : vector<4x1x8x8xbf16> to vector<1x1x8x8xbf16>
    %124 = vector.shape_cast %123 : vector<1x1x8x8xbf16> to vector<1x8x8xbf16>
    %125 = vector.shape_cast %124 : vector<1x8x8xbf16> to vector<8x8xbf16>
    %c0_95 = arith.constant 0 : index
    %c16_96 = arith.constant 16 : index
    %126 = vector.load %arg19[%c0_95, %c16_96] : memref<8x32xbf16, #tpu.memory_space<vmem>>, vector<8x8xbf16>
    tpu.vector_store %arg19[%c0_95, %c16_96], %125 {strides = array<i32>} : memref<8x32xbf16, #tpu.memory_space<vmem>>, vector<8x8xbf16>,
    %127 = vector.extract_strided_slice %114 {offsets = [3, 0, 0, 0], sizes = [1, 1, 8, 8], strides = [1, 1, 1, 1]} : vector<4x1x8x8xbf16> to vector<1x1x8x8xbf16>
    %128 = vector.shape_cast %127 : vector<1x1x8x8xbf16> to vector<1x8x8xbf16>
    %129 = vector.shape_cast %128 : vector<1x8x8xbf16> to vector<8x8xbf16>
    %c0_97 = arith.constant 0 : index
    %c24_98 = arith.constant 24 : index
    %130 = vector.load %arg19[%c0_97, %c24_98] : memref<8x32xbf16, #tpu.memory_space<vmem>>, vector<8x8xbf16>
    tpu.vector_store %arg19[%c0_97, %c24_98], %129 {strides = array<i32>} : memref<8x32xbf16, #tpu.memory_space<vmem>>, vector<8x8xbf16>,
    %c0_99 = arith.constant 0 : index
    %c0_100 = arith.constant 0 : index
    %131 = vector.load %arg19[%c0_99, %c0_100] : memref<8x32xbf16, #tpu.memory_space<vmem>>, vector<8x32xbf16>
    %c0_101 = arith.constant 0 : index
    %c0_102 = arith.constant 0 : index
    %132 = vector.load %arg6[%c0_101, %c0_102] : memref<32x32xbf16, #tpu.memory_space<vmem>>, vector<32x32xbf16>
    %cst_103 = arith.constant dense<0.000000e+00> : vector<8x32xf32>
    %133 = tpu.matmul %131, %132, %cst_103 {dimension_numbers = #tpu.dot_dimension_numbers<[1], [0], [0], [1], [0, 0, 1, 1], [], []>} : vector<8x32xbf16>, vector<32x32xbf16>, vector<8x32xf32> -> vector<8x32xf32>
    %c0_104 = arith.constant 0 : index
    %c0_105 = arith.constant 0 : index
    %134 = vector.load %arg7[%c0_104, %c0_105] : memref<1x32xf32, #tpu.memory_space<vmem>>, vector<1x32xf32>
    %135 = vector.broadcast %134 : vector<1x32xf32> to vector<8x32xf32>
    %136 = arith.addf %133, %135 : vector<8x32xf32>
    %137 = arith.addf %1, %136 : vector<8x32xf32>
    %c0_106 = arith.constant 0 : index
    %c0_107 = arith.constant 0 : index
    %138 = vector.load %arg8[%c0_106, %c0_107] : memref<1x32xf32, #tpu.memory_space<vmem>>, vector<1x32xf32>
    %c0_108 = arith.constant 0 : index
    %c0_109 = arith.constant 0 : index
    %139 = vector.load %arg9[%c0_108, %c0_109] : memref<1x32xf32, #tpu.memory_space<vmem>>, vector<1x32xf32>
    %cst_110 = arith.constant dense<0.000000e+00> : vector<8xf32>
    %140 = vector.multi_reduction <add>, %137, %cst_110 [1] : vector<8x32xf32> to vector<8xf32>
    %141 = vector.shape_cast %140 : vector<8xf32> to vector<8x1xf32>
    %cst_111 = arith.constant 3.200000e+01 : f32
    %142 = vector.broadcast %cst_111 : f32 to vector<8x1xf32>
    %143 = arith.divf %141, %142 : vector<8x1xf32>
    %144 = vector.broadcast %143 : vector<8x1xf32> to vector<8x32xf32>
    %145 = arith.subf %137, %144 : vector<8x32xf32>
    %146 = arith.mulf %145, %145 : vector<8x32xf32>
    %cst_112 = arith.constant dense<0.000000e+00> : vector<8xf32>
    %147 = vector.multi_reduction <add>, %146, %cst_112 [1] : vector<8x32xf32> to vector<8xf32>
    %148 = vector.shape_cast %147 : vector<8xf32> to vector<8x1xf32>
    %cst_113 = arith.constant 3.200000e+01 : f32
    %149 = vector.broadcast %cst_113 : f32 to vector<8x1xf32>
    %150 = arith.divf %148, %149 : vector<8x1xf32>
    %151 = vector.broadcast %143 : vector<8x1xf32> to vector<8x32xf32>
    %152 = arith.subf %137, %151 : vector<8x32xf32>
    %cst_114 = arith.constant 9.99999974E-6 : f32
    %153 = vector.broadcast %cst_114 : f32 to vector<8x1xf32>
    %154 = arith.addf %150, %153 : vector<8x1xf32>
    %155 = math.rsqrt %154 : vector<8x1xf32>
    %156 = vector.broadcast %155 : vector<8x1xf32> to vector<8x32xf32>
    %157 = arith.mulf %152, %156 : vector<8x32xf32>
    %158 = vector.broadcast %138 : vector<1x32xf32> to vector<8x32xf32>
    %159 = arith.mulf %157, %158 : vector<8x32xf32>
    %160 = vector.broadcast %139 : vector<1x32xf32> to vector<8x32xf32>
    %161 = arith.addf %159, %160 : vector<8x32xf32>
    %162 = arith.truncf %161 : vector<8x32xf32> to vector<8x32xbf16>
    %c0_115 = arith.constant 0 : index
    %c0_116 = arith.constant 0 : index
    %163 = vector.load %arg10[%c0_115, %c0_116] : memref<32x128xbf16, #tpu.memory_space<vmem>>, vector<32x128xbf16>
    %cst_117 = arith.constant dense<0.000000e+00> : vector<8x128xf32>
    %164 = tpu.matmul %162, %163, %cst_117 {dimension_numbers = #tpu.dot_dimension_numbers<[1], [0], [0], [1], [0, 0, 1, 1], [], []>} : vector<8x32xbf16>, vector<32x128xbf16>, vector<8x128xf32> -> vector<8x128xf32>
    %c0_118 = arith.constant 0 : index
    %c0_119 = arith.constant 0 : index
    %165 = vector.load %arg11[%c0_118, %c0_119] : memref<1x128xf32, #tpu.memory_space<vmem>>, vector<1x128xf32>
    %166 = vector.broadcast %165 : vector<1x128xf32> to vector<8x128xf32>
    %167 = arith.addf %164, %166 : vector<8x128xf32>
    %cst_120 = arith.constant 5.000000e-01 : f32
    %168 = vector.broadcast %cst_120 : f32 to vector<8x128xf32>
    %169 = arith.mulf %168, %167 : vector<8x128xf32>
    %cst_121 = arith.constant 0.707106769 : f32
    %170 = vector.broadcast %cst_121 : f32 to vector<8x128xf32>
    %171 = arith.mulf %167, %170 : vector<8x128xf32>
    %172 = math.erf %171 : vector<8x128xf32>
    %cst_122 = arith.constant 1.000000e+00 : f32
    %173 = vector.broadcast %cst_122 : f32 to vector<8x128xf32>
    %174 = arith.addf %173, %172 : vector<8x128xf32>
    %175 = arith.mulf %169, %174 : vector<8x128xf32>
    %176 = arith.truncf %175 : vector<8x128xf32> to vector<8x128xbf16>
    %c0_123 = arith.constant 0 : index
    %c0_124 = arith.constant 0 : index
    %177 = vector.load %arg12[%c0_123, %c0_124] : memref<128x32xbf16, #tpu.memory_space<vmem>>, vector<128x32xbf16>
    %cst_125 = arith.constant dense<0.000000e+00> : vector<8x32xf32>
    %178 = tpu.matmul %176, %177, %cst_125 {dimension_numbers = #tpu.dot_dimension_numbers<[1], [0], [0], [1], [0, 0, 1, 1], [], []>} : vector<8x128xbf16>, vector<128x32xbf16>, vector<8x32xf32> -> vector<8x32xf32>
    %c0_126 = arith.constant 0 : index
    %c0_127 = arith.constant 0 : index
    %179 = vector.load %arg13[%c0_126, %c0_127] : memref<1x32xf32, #tpu.memory_space<vmem>>, vector<1x32xf32>
    %180 = vector.broadcast %179 : vector<1x32xf32> to vector<8x32xf32>
    %181 = arith.addf %178, %180 : vector<8x32xf32>
    %182 = arith.addf %137, %181 : vector<8x32xf32>
    %183 = vector.shape_cast %182 : vector<8x32xf32> to vector<1x8x32xf32>
    %c0_128 = arith.constant 0 : index
    %c0_129 = arith.constant 0 : index
    %c0_130 = arith.constant 0 : index
    %184 = vector.load %arg14[%c0_128, %c0_129, %c0_130] : memref<1x8x32xf32, #tpu.memory_space<vmem>>, vector<1x8x32xf32>
    tpu.vector_store %arg14[%c0_128, %c0_129, %c0_130], %183 {strides = array<i32>} : memref<1x8x32xf32, #tpu.memory_space<vmem>>, vector<1x8x32xf32>,
    return
  }
  func.func @transform_0(%arg0: i32) -> (i32, i32, i32) {
    %c0_i32 = arith.constant 0 : i32
    %c0_i32_0 = arith.constant 0 : i32
    %c0_i32_1 = arith.constant 0 : i32
    return %arg0, %c0_i32, %c0_i32_0 : i32, i32, i32
  }
  func.func @transform_1(%arg0: i32) -> (i32, i32) {
    %c0_i32 = arith.constant 0 : i32
    %c0_i32_0 = arith.constant 0 : i32
    %c0_i32_1 = arith.constant 0 : i32
    return %c0_i32, %c0_i32_0 : i32, i32
  }
  func.func @transform_2(%arg0: i32) -> (i32, i32) {
    %c0_i32 = arith.constant 0 : i32
    %c0_i32_0 = arith.constant 0 : i32
    %c0_i32_1 = arith.constant 0 : i32
    return %c0_i32, %c0_i32_0 : i32, i32
  }
  func.func @transform_3(%arg0: i32) -> (i32, i32) {
    %c0_i32 = arith.constant 0 : i32
    %c0_i32_0 = arith.constant 0 : i32
    %c0_i32_1 = arith.constant 0 : i32
    return %c0_i32, %c0_i32_0 : i32, i32
  }
  func.func @transform_4(%arg0: i32) -> (i32, i32) {
    %c0_i32 = arith.constant 0 : i32
    %c0_i32_0 = arith.constant 0 : i32
    %c0_i32_1 = arith.constant 0 : i32
    return %c0_i32, %c0_i32_0 : i32, i32
  }
  func.func @transform_5(%arg0: i32) -> (i32, i32) {
    %c0_i32 = arith.constant 0 : i32
    %c0_i32_0 = arith.constant 0 : i32
    %c0_i32_1 = arith.constant 0 : i32
    return %c0_i32, %c0_i32_0 : i32, i32
  }
  func.func @transform_6(%arg0: i32) -> (i32, i32) {
    %c0_i32 = arith.constant 0 : i32
    %c0_i32_0 = arith.constant 0 : i32
    %c0_i32_1 = arith.constant 0 : i32
    return %c0_i32, %c0_i32_0 : i32, i32
  }
  func.func @transform_7(%arg0: i32) -> (i32, i32) {
    %c0_i32 = arith.constant 0 : i32
    %c0_i32_0 = arith.constant 0 : i32
    %c0_i32_1 = arith.constant 0 : i32
    return %c0_i32, %c0_i32_0 : i32, i32
  }
  func.func @transform_8(%arg0: i32) -> (i32, i32) {
    %c0_i32 = arith.constant 0 : i32
    %c0_i32_0 = arith.constant 0 : i32
    %c0_i32_1 = arith.constant 0 : i32
    return %c0_i32, %c0_i32_0 : i32, i32
  }
  func.func @transform_9(%arg0: i32) -> (i32, i32) {
    %c0_i32 = arith.constant 0 : i32
    %c0_i32_0 = arith.constant 0 : i32
    %c0_i32_1 = arith.constant 0 : i32
    return %c0_i32, %c0_i32_0 : i32, i32
  }
  func.func @transform_10(%arg0: i32) -> (i32, i32) {
    %c0_i32 = arith.constant 0 : i32
    %c0_i32_0 = arith.constant 0 : i32
    %c0_i32_1 = arith.constant 0 : i32
    return %c0_i32, %c0_i32_0 : i32, i32
  }
  func.func @transform_11(%arg0: i32) -> (i32, i32) {
    %c0_i32 = arith.constant 0 : i32
    %c0_i32_0 = arith.constant 0 : i32
    %c0_i32_1 = arith.constant 0 : i32
    return %c0_i32, %c0_i32_0 : i32, i32
  }
  func.func @transform_12(%arg0: i32) -> (i32, i32) {
    %c0_i32 = arith.constant 0 : i32
    %c0_i32_0 = arith.constant 0 : i32
    %c0_i32_1 = arith.constant 0 : i32
    return %c0_i32, %c0_i32_0 : i32, i32
  }
  func.func @transform_13(%arg0: i32) -> (i32, i32, i32) {
    %c0_i32 = arith.constant 0 : i32
    %c0_i32_0 = arith.constant 0 : i32
    %c0_i32_1 = arith.constant 0 : i32
    return %arg0, %c0_i32, %c0_i32_0 : i32, i32, i32
  }
}

module attributes {stable_mosaic.version = 11 : i64} {
  func.func @encoder_block_kernel(%arg0: i32, %arg1: memref<1x8x32xf32, #tpu.memory_space<vmem>>, %arg2: memref<1x32xf32, #tpu.memory_space<vmem>>, %arg3: memref<1x32xf32, #tpu.memory_space<vmem>>, %arg4: memref<32x96xbf16, #tpu.memory_space<vmem>>, %arg5: memref<1x96xf32, #tpu.memory_space<vmem>>, %arg6: memref<32x32xbf16, #tpu.memory_space<vmem>>, %arg7: memref<1x32xf32, #tpu.memory_space<vmem>>, %arg8: memref<1x32xf32, #tpu.memory_space<vmem>>, %arg9: memref<1x32xf32, #tpu.memory_space<vmem>>, %arg10: memref<32x128xbf16, #tpu.memory_space<vmem>>, %arg11: memref<1x128xf32, #tpu.memory_space<vmem>>, %arg12: memref<128x32xbf16, #tpu.memory_space<vmem>>, %arg13: memref<1x32xf32, #tpu.memory_space<vmem>>, %arg14: memref<1x8x32xf32, #tpu.memory_space<vmem>>, %arg15: memref<8x96xbf16, #tpu.memory_space<vmem>>, %arg16: memref<4x1x8x8xbf16, #tpu.memory_space<vmem>>, %arg17: memref<4x1x8x8xbf16, #tpu.memory_space<vmem>>, %arg18: memref<4x1x8x8xbf16, #tpu.memory_space<vmem>>, %arg19: memref<8x32xbf16, #tpu.memory_space<vmem>>) attributes {dimension_semantics = [#tpu.dimension_semantics<parallel>], iteration_bounds = array<i64: 2>, scalar_prefetch = 0 : i64, scratch_operands = 5 : i64, tpu.core_type = #tpu.core_type<tc>, window_params = [{transform_indices = @transform_0, window_bounds = array<i64: 1, 8, 32>}, {pipeline_mode = #tpu.pipeline_mode<synchronous>, transform_indices = @transform_1, window_bounds = array<i64: 1, 32>}, {pipeline_mode = #tpu.pipeline_mode<synchronous>, transform_indices = @transform_2, window_bounds = array<i64: 1, 32>}, {pipeline_mode = #tpu.pipeline_mode<synchronous>, transform_indices = @transform_3, window_bounds = array<i64: 32, 96>}, {pipeline_mode = #tpu.pipeline_mode<synchronous>, transform_indices = @transform_4, window_bounds = array<i64: 1, 96>}, {pipeline_mode = #tpu.pipeline_mode<synchronous>, transform_indices = @transform_5, window_bounds = array<i64: 32, 32>}, {pipeline_mode = #tpu.pipeline_mode<synchronous>, transform_indices = @transform_6, window_bounds = array<i64: 1, 32>}, {pipeline_mode = #tpu.pipeline_mode<synchronous>, transform_indices = @transform_7, window_bounds = array<i64: 1, 32>}, {pipeline_mode = #tpu.pipeline_mode<synchronous>, transform_indices = @transform_8, window_bounds = array<i64: 1, 32>}, {pipeline_mode = #tpu.pipeline_mode<synchronous>, transform_indices = @transform_9, window_bounds = array<i64: 32, 128>}, {pipeline_mode = #tpu.pipeline_mode<synchronous>, transform_indices = @transform_10, window_bounds = array<i64: 1, 128>}, {pipeline_mode = #tpu.pipeline_mode<synchronous>, transform_indices = @transform_11, window_bounds = array<i64: 128, 32>}, {pipeline_mode = #tpu.pipeline_mode<synchronous>, transform_indices = @transform_12, window_bounds = array<i64: 1, 32>}, {transform_indices = @transform_13, window_bounds = array<i64: 1, 8, 32>}]} {
    %c0 = arith.constant 0 : index
    %c0_0 = arith.constant 0 : index
    %c0_1 = arith.constant 0 : index
    %0 = vector.load %arg1[%c0, %c0_0, %c0_1] : memref<1x8x32xf32, #tpu.memory_space<vmem>>, vector<1x8x32xf32>
    %1 = vector.shape_cast %0 : vector<1x8x32xf32> to vector<8x32xf32>
    %c0_2 = arith.constant 0 : index
    %c0_3 = arith.constant 0 : index
    %2 = vector.load %arg2[%c0_2, %c0_3] : memref<1x32xf32, #tpu.memory_space<vmem>>, vector<1x32xf32>
    %c0_4 = arith.constant 0 : index
    %c0_5 = arith.constant 0 : index
    %3 = vector.load %arg3[%c0_4, %c0_5] : memref<1x32xf32, #tpu.memory_space<vmem>>, vector<1x32xf32>
    %cst = arith.constant dense<0.000000e+00> : vector<8xf32>
    %4 = vector.multi_reduction <add>, %1, %cst [1] : vector<8x32xf32> to vector<8xf32>
    %5 = vector.shape_cast %4 : vector<8xf32> to vector<8x1xf32>
    %cst_6 = arith.constant 3.200000e+01 : f32
    %6 = vector.broadcast %cst_6 : f32 to vector<8x1xf32>
    %7 = arith.divf %5, %6 : vector<8x1xf32>
    %8 = vector.broadcast %7 : vector<8x1xf32> to vector<8x32xf32>
    %9 = arith.subf %1, %8 : vector<8x32xf32>
    %10 = arith.mulf %9, %9 : vector<8x32xf32>
    %cst_7 = arith.constant dense<0.000000e+00> : vector<8xf32>
    %11 = vector.multi_reduction <add>, %10, %cst_7 [1] : vector<8x32xf32> to vector<8xf32>
    %12 = vector.shape_cast %11 : vector<8xf32> to vector<8x1xf32>
    %cst_8 = arith.constant 3.200000e+01 : f32
    %13 = vector.broadcast %cst_8 : f32 to vector<8x1xf32>
    %14 = arith.divf %12, %13 : vector<8x1xf32>
    %15 = vector.broadcast %7 : vector<8x1xf32> to vector<8x32xf32>
    %16 = arith.subf %1, %15 : vector<8x32xf32>
    %cst_9 = arith.constant 9.99999974E-6 : f32
    %17 = vector.broadcast %cst_9 : f32 to vector<8x1xf32>
    %18 = arith.addf %14, %17 : vector<8x1xf32>
    %19 = math.rsqrt %18 : vector<8x1xf32>
    %20 = vector.broadcast %19 : vector<8x1xf32> to vector<8x32xf32>
    %21 = arith.mulf %16, %20 : vector<8x32xf32>
    %22 = vector.broadcast %2 : vector<1x32xf32> to vector<8x32xf32>
    %23 = arith.mulf %21, %22 : vector<8x32xf32>
    %24 = vector.broadcast %3 : vector<1x32xf32> to vector<8x32xf32>
    %25 = arith.addf %23, %24 : vector<8x32xf32>
    %26 = arith.truncf %25 : vector<8x32xf32> to vector<8x32xbf16>
    %c0_10 = arith.constant 0 : index
    %c0_11 = arith.constant 0 : index
    %27 = vector.load %arg4[%c0_10, %c0_11] : memref<32x96xbf16, #tpu.memory_space<vmem>>, vector<32x96xbf16>
    %cst_12 = arith.constant dense<0.000000e+00> : vector<8x96xf32>
    %28 = tpu.matmul %26, %27, %cst_12 {dimension_numbers = #tpu.dot_dimension_numbers<[1], [0], [0], [1], [0, 0, 1, 1], [], []>} : vector<8x32xbf16>, vector<32x96xbf16>, vector<8x96xf32> -> vector<8x96xf32>
    %c0_13 = arith.constant 0 : index
    %c0_14 = arith.constant 0 : index
    %29 = vector.load %arg5[%c0_13, %c0_14] : memref<1x96xf32, #tpu.memory_space<vmem>>, vector<1x96xf32>
    %30 = vector.broadcast %29 : vector<1x96xf32> to vector<8x96xf32>
    %31 = arith.addf %28, %30 : vector<8x96xf32>
    %32 = arith.truncf %31 : vector<8x96xf32> to vector<8x96xbf16>
    %c0_15 = arith.constant 0 : index
    %c0_16 = arith.constant 0 : index
    %33 = vector.load %arg15[%c0_15, %c0_16] : memref<8x96xbf16, #tpu.memory_space<vmem>>, vector<8x96xbf16>
    tpu.vector_store %arg15[%c0_15, %c0_16], %32 {strides = array<i32>} : memref<8x96xbf16, #tpu.memory_space<vmem>>, vector<8x96xbf16>,
    %c0_17 = arith.constant 0 : index
    %c0_18 = arith.constant 0 : index
    %34 = vector.load %arg15[%c0_17, %c0_18] : memref<8x96xbf16, #tpu.memory_space<vmem>>, vector<8x8xbf16>
    %35 = vector.shape_cast %34 : vector<8x8xbf16> to vector<1x8x8xbf16>
    %c0_19 = arith.constant 0 : index
    %c0_20 = arith.constant 0 : index
    %c0_21 = arith.constant 0 : index
    %c0_22 = arith.constant 0 : index
    %36 = vector.load %arg16[%c0_19, %c0_20, %c0_21, %c0_22] : memref<4x1x8x8xbf16, #tpu.memory_space<vmem>>, vector<1x1x8x8xbf16>
    %37 = vector.shape_cast %36 : vector<1x1x8x8xbf16> to vector<1x8x8xbf16>
    %38 = vector.shape_cast %35 : vector<1x8x8xbf16> to vector<1x1x8x8xbf16>
    tpu.vector_store %arg16[%c0_19, %c0_20, %c0_21, %c0_22], %38 {strides = array<i32>} : memref<4x1x8x8xbf16, #tpu.memory_space<vmem>>, vector<1x1x8x8xbf16>,
    %c0_23 = arith.constant 0 : index
    %c32 = arith.constant 32 : index
    %39 = vector.load %arg15[%c0_23, %c32] : memref<8x96xbf16, #tpu.memory_space<vmem>>, vector<8x8xbf16>
    %40 = vector.shape_cast %39 : vector<8x8xbf16> to vector<1x8x8xbf16>
    %c0_24 = arith.constant 0 : index
    %c0_25 = arith.constant 0 : index
    %c0_26 = arith.constant 0 : index
    %c0_27 = arith.constant 0 : index
    %41 = vector.load %arg17[%c0_24, %c0_25, %c0_26, %c0_27] : memref<4x1x8x8xbf16, #tpu.memory_space<vmem>>, vector<1x1x8x8xbf16>
    %42 = vector.shape_cast %41 : vector<1x1x8x8xbf16> to vector<1x8x8xbf16>
    %43 = vector.shape_cast %40 : vector<1x8x8xbf16> to vector<1x1x8x8xbf16>
    tpu.vector_store %arg17[%c0_24, %c0_25, %c0_26, %c0_27], %43 {strides = array<i32>} : memref<4x1x8x8xbf16, #tpu.memory_space<vmem>>, vector<1x1x8x8xbf16>,
    %c0_28 = arith.constant 0 : index
    %c64 = arith.constant 64 : index
    %44 = vector.load %arg15[%c0_28, %c64] : memref<8x96xbf16, #tpu.memory_space<vmem>>, vector<8x8xbf16>
    %45 = vector.shape_cast %44 : vector<8x8xbf16> to vector<1x8x8xbf16>
    %c0_29 = arith.constant 0 : index
    %c0_30 = arith.constant 0 : index
    %c0_31 = arith.constant 0 : index
    %c0_32 = arith.constant 0 : index
    %46 = vector.load %arg18[%c0_29, %c0_30, %c0_31, %c0_32] : memref<4x1x8x8xbf16, #tpu.memory_space<vmem>>, vector<1x1x8x8xbf16>
    %47 = vector.shape_cast %46 : vector<1x1x8x8xbf16> to vector<1x8x8xbf16>
    %48 = vector.shape_cast %45 : vector<1x8x8xbf16> to vector<1x1x8x8xbf16>
    tpu.vector_store %arg18[%c0_29, %c0_30, %c0_31, %c0_32], %48 {strides = array<i32>} : memref<4x1x8x8xbf16, #tpu.memory_space<vmem>>, vector<1x1x8x8xbf16>,
    %c0_33 = arith.constant 0 : index
    %c8 = arith.constant 8 : index
    %49 = vector.load %arg15[%c0_33, %c8] : memref<8x96xbf16, #tpu.memory_space<vmem>>, vector<8x8xbf16>
    %50 = vector.shape_cast %49 : vector<8x8xbf16> to vector<1x8x8xbf16>
    %c1 = arith.constant 1 : index
    %c0_34 = arith.constant 0 : index
    %c0_35 = arith.constant 0 : index
    %c0_36 = arith.constant 0 : index
    %51 = vector.load %arg16[%c1, %c0_34, %c0_35, %c0_36] : memref<4x1x8x8xbf16, #tpu.memory_space<vmem>>, vector<1x1x8x8xbf16>
    %52 = vector.shape_cast %51 : vector<1x1x8x8xbf16> to vector<1x8x8xbf16>
    %53 = vector.shape_cast %50 : vector<1x8x8xbf16> to vector<1x1x8x8xbf16>
    tpu.vector_store %arg16[%c1, %c0_34, %c0_35, %c0_36], %53 {strides = array<i32>} : memref<4x1x8x8xbf16, #tpu.memory_space<vmem>>, vector<1x1x8x8xbf16>,
    %c0_37 = arith.constant 0 : index
    %c40 = arith.constant 40 : index
    %54 = vector.load %arg15[%c0_37, %c40] : memref<8x96xbf16, #tpu.memory_space<vmem>>, vector<8x8xbf16>
    %55 = vector.shape_cast %54 : vector<8x8xbf16> to vector<1x8x8xbf16>
    %c1_38 = arith.constant 1 : index
    %c0_39 = arith.constant 0 : index
    %c0_40 = arith.constant 0 : index
    %c0_41 = arith.constant 0 : index
    %56 = vector.load %arg17[%c1_38, %c0_39, %c0_40, %c0_41] : memref<4x1x8x8xbf16, #tpu.memory_space<vmem>>, vector<1x1x8x8xbf16>
    %57 = vector.shape_cast %56 : vector<1x1x8x8xbf16> to vector<1x8x8xbf16>
    %58 = vector.shape_cast %55 : vector<1x8x8xbf16> to vector<1x1x8x8xbf16>
    tpu.vector_store %arg17[%c1_38, %c0_39, %c0_40, %c0_41], %58 {strides = array<i32>} : memref<4x1x8x8xbf16, #tpu.memory_space<vmem>>, vector<1x1x8x8xbf16>,
    %c0_42 = arith.constant 0 : index
    %c72 = arith.constant 72 : index
    %59 = vector.load %arg15[%c0_42, %c72] : memref<8x96xbf16, #tpu.memory_space<vmem>>, vector<8x8xbf16>
    %60 = vector.shape_cast %59 : vector<8x8xbf16> to vector<1x8x8xbf16>
    %c1_43 = arith.constant 1 : index
    %c0_44 = arith.constant 0 : index
    %c0_45 = arith.constant 0 : index
    %c0_46 = arith.constant 0 : index
    %61 = vector.load %arg18[%c1_43, %c0_44, %c0_45, %c0_46] : memref<4x1x8x8xbf16, #tpu.memory_space<vmem>>, vector<1x1x8x8xbf16>
    %62 = vector.shape_cast %61 : vector<1x1x8x8xbf16> to vector<1x8x8xbf16>
    %63 = vector.shape_cast %60 : vector<1x8x8xbf16> to vector<1x1x8x8xbf16>
    tpu.vector_store %arg18[%c1_43, %c0_44, %c0_45, %c0_46], %63 {strides = array<i32>} : memref<4x1x8x8xbf16, #tpu.memory_space<vmem>>, vector<1x1x8x8xbf16>,
    %c0_47 = arith.constant 0 : index
    %c16 = arith.constant 16 : index
    %64 = vector.load %arg15[%c0_47, %c16] : memref<8x96xbf16, #tpu.memory_space<vmem>>, vector<8x8xbf16>
    %65 = vector.shape_cast %64 : vector<8x8xbf16> to vector<1x8x8xbf16>
    %c2 = arith.constant 2 : index
    %c0_48 = arith.constant 0 : index
    %c0_49 = arith.constant 0 : index
    %c0_50 = arith.constant 0 : index
    %66 = vector.load %arg16[%c2, %c0_48, %c0_49, %c0_50] : memref<4x1x8x8xbf16, #tpu.memory_space<vmem>>, vector<1x1x8x8xbf16>
    %67 = vector.shape_cast %66 : vector<1x1x8x8xbf16> to vector<1x8x8xbf16>
    %68 = vector.shape_cast %65 : vector<1x8x8xbf16> to vector<1x1x8x8xbf16>
    tpu.vector_store %arg16[%c2, %c0_48, %c0_49, %c0_50], %68 {strides = array<i32>} : memref<4x1x8x8xbf16, #tpu.memory_space<vmem>>, vector<1x1x8x8xbf16>,
    %c0_51 = arith.constant 0 : index
    %c48 = arith.constant 48 : index
    %69 = vector.load %arg15[%c0_51, %c48] : memref<8x96xbf16, #tpu.memory_space<vmem>>, vector<8x8xbf16>
    %70 = vector.shape_cast %69 : vector<8x8xbf16> to vector<1x8x8xbf16>
    %c2_52 = arith.constant 2 : index
    %c0_53 = arith.constant 0 : index
    %c0_54 = arith.constant 0 : index
    %c0_55 = arith.constant 0 : index
    %71 = vector.load %arg17[%c2_52, %c0_53, %c0_54, %c0_55] : memref<4x1x8x8xbf16, #tpu.memory_space<vmem>>, vector<1x1x8x8xbf16>
    %72 = vector.shape_cast %71 : vector<1x1x8x8xbf16> to vector<1x8x8xbf16>
    %73 = vector.shape_cast %70 : vector<1x8x8xbf16> to vector<1x1x8x8xbf16>
    tpu.vector_store %arg17[%c2_52, %c0_53, %c0_54, %c0_55], %73 {strides = array<i32>} : memref<4x1x8x8xbf16, #tpu.memory_space<vmem>>, vector<1x1x8x8xbf16>,
    %c0_56 = arith.constant 0 : index
    %c80 = arith.constant 80 : index
    %74 = vector.load %arg15[%c0_56, %c80] : memref<8x96xbf16, #tpu.memory_space<vmem>>, vector<8x8xbf16>
    %75 = vector.shape_cast %74 : vector<8x8xbf16> to vector<1x8x8xbf16>
    %c2_57 = arith.constant 2 : index
    %c0_58 = arith.constant 0 : index
    %c0_59 = arith.constant 0 : index
    %c0_60 = arith.constant 0 : index
    %76 = vector.load %arg18[%c2_57, %c0_58, %c0_59, %c0_60] : memref<4x1x8x8xbf16, #tpu.memory_space<vmem>>, vector<1x1x8x8xbf16>
    %77 = vector.shape_cast %76 : vector<1x1x8x8xbf16> to vector<1x8x8xbf16>
    %78 = vector.shape_cast %75 : vector<1x8x8xbf16> to vector<1x1x8x8xbf16>
    tpu.vector_store %arg18[%c2_57, %c0_58, %c0_59, %c0_60], %78 {strides = array<i32>} : memref<4x1x8x8xbf16, #tpu.memory_space<vmem>>, vector<1x1x8x8xbf16>,
    %c0_61 = arith.constant 0 : index
    %c24 = arith.constant 24 : index
    %79 = vector.load %arg15[%c0_61, %c24] : memref<8x96xbf16, #tpu.memory_space<vmem>>, vector<8x8xbf16>
    %80 = vector.shape_cast %79 : vector<8x8xbf16> to vector<1x8x8xbf16>
    %c3 = arith.constant 3 : index
    %c0_62 = arith.constant 0 : index
    %c0_63 = arith.constant 0 : index
    %c0_64 = arith.constant 0 : index
    %81 = vector.load %arg16[%c3, %c0_62, %c0_63, %c0_64] : memref<4x1x8x8xbf16, #tpu.memory_space<vmem>>, vector<1x1x8x8xbf16>
    %82 = vector.shape_cast %81 : vector<1x1x8x8xbf16> to vector<1x8x8xbf16>
    %83 = vector.shape_cast %80 : vector<1x8x8xbf16> to vector<1x1x8x8xbf16>
    tpu.vector_store %arg16[%c3, %c0_62, %c0_63, %c0_64], %83 {strides = array<i32>} : memref<4x1x8x8xbf16, #tpu.memory_space<vmem>>, vector<1x1x8x8xbf16>,
    %c0_65 = arith.constant 0 : index
    %c56 = arith.constant 56 : index
    %84 = vector.load %arg15[%c0_65, %c56] : memref<8x96xbf16, #tpu.memory_space<vmem>>, vector<8x8xbf16>
    %85 = vector.shape_cast %84 : vector<8x8xbf16> to vector<1x8x8xbf16>
    %c3_66 = arith.constant 3 : index
    %c0_67 = arith.constant 0 : index
    %c0_68 = arith.constant 0 : index
    %c0_69 = arith.constant 0 : index
    %86 = vector.load %arg17[%c3_66, %c0_67, %c0_68, %c0_69] : memref<4x1x8x8xbf16, #tpu.memory_space<vmem>>, vector<1x1x8x8xbf16>
    %87 = vector.shape_cast %86 : vector<1x1x8x8xbf16> to vector<1x8x8xbf16>
    %88 = vector.shape_cast %85 : vector<1x8x8xbf16> to vector<1x1x8x8xbf16>
    tpu.vector_store %arg17[%c3_66, %c0_67, %c0_68, %c0_69], %88 {strides = array<i32>} : memref<4x1x8x8xbf16, #tpu.memory_space<vmem>>, vector<1x1x8x8xbf16>,
    %c0_70 = arith.constant 0 : index
    %c88 = arith.constant 88 : index
    %89 = vector.load %arg15[%c0_70, %c88] : memref<8x96xbf16, #tpu.memory_space<vmem>>, vector<8x8xbf16>
    %90 = vector.shape_cast %89 : vector<8x8xbf16> to vector<1x8x8xbf16>
    %c3_71 = arith.constant 3 : index
    %c0_72 = arith.constant 0 : index
    %c0_73 = arith.constant 0 : index
    %c0_74 = arith.constant 0 : index
    %91 = vector.load %arg18[%c3_71, %c0_72, %c0_73, %c0_74] : memref<4x1x8x8xbf16, #tpu.memory_space<vmem>>, vector<1x1x8x8xbf16>
    %92 = vector.shape_cast %91 : vector<1x1x8x8xbf16> to vector<1x8x8xbf16>
    %93 = vector.shape_cast %90 : vector<1x8x8xbf16> to vector<1x1x8x8xbf16>
    tpu.vector_store %arg18[%c3_71, %c0_72, %c0_73, %c0_74], %93 {strides = array<i32>} : memref<4x1x8x8xbf16, #tpu.memory_space<vmem>>, vector<1x1x8x8xbf16>,
    %c0_75 = arith.constant 0 : index
    %c0_76 = arith.constant 0 : index
    %c0_77 = arith.constant 0 : index
    %c0_78 = arith.constant 0 : index
    %94 = vector.load %arg16[%c0_75, %c0_76, %c0_77, %c0_78] : memref<4x1x8x8xbf16, #tpu.memory_space<vmem>>, vector<4x1x8x8xbf16>
    %95 = vector.shape_cast %94 : vector<4x1x8x8xbf16> to vector<4x8x8xbf16>
    %c0_79 = arith.constant 0 : index
    %c0_80 = arith.constant 0 : index
    %c0_81 = arith.constant 0 : index
    %c0_82 = arith.constant 0 : index
    %96 = vector.load %arg17[%c0_79, %c0_80, %c0_81, %c0_82] : memref<4x1x8x8xbf16, #tpu.memory_space<vmem>>, vector<4x1x8x8xbf16>
    %97 = vector.shape_cast %96 : vector<4x1x8x8xbf16> to vector<4x8x8xbf16>
    %c0_83 = arith.constant 0 : index
    %c0_84 = arith.constant 0 : index
    %c0_85 = arith.constant 0 : index
    %c0_86 = arith.constant 0 : index
    %98 = vector.load %arg18[%c0_83, %c0_84, %c0_85, %c0_86] : memref<4x1x8x8xbf16, #tpu.memory_space<vmem>>, vector<4x1x8x8xbf16>
    %99 = vector.shape_cast %98 : vector<4x1x8x8xbf16> to vector<4x8x8xbf16>
    "tpu.trace_start"() <{level = 10 : i32, message = "bqd,bkd->bqk"}> : () -> ()
    %cst_87 = arith.constant dense<0.000000e+00> : vector<4x8x8xf32>
    %100 = tpu.matmul %95, %97, %cst_87 {dimension_numbers = #tpu.dot_dimension_numbers<[2], [2], [1], [1], [0, 0, 0, 1, 1, 1], [0], [0]>} : vector<4x8x8xbf16>, vector<4x8x8xbf16>, vector<4x8x8xf32> -> vector<4x8x8xf32>
    "tpu.trace_stop"() : () -> ()
    %cst_88 = arith.constant dense<0xFF800000> : vector<4x8xf32>
    %101 = vector.multi_reduction <maximumf>, %100, %cst_88 [2] : vector<4x8x8xf32> to vector<4x8xf32>
    %102 = vector.shape_cast %101 : vector<4x8xf32> to vector<4x8x1xf32>
    %103 = vector.broadcast %102 : vector<4x8x1xf32> to vector<4x8x8xf32>
    %104 = arith.subf %100, %103 : vector<4x8x8xf32>
    %105 = math.exp %104 : vector<4x8x8xf32>
    %cst_89 = arith.constant dense<0.000000e+00> : vector<4x8xf32>
    %106 = vector.multi_reduction <add>, %105, %cst_89 [2] : vector<4x8x8xf32> to vector<4x8xf32>
    %107 = vector.shape_cast %106 : vector<4x8xf32> to vector<4x8x1xf32>
    %108 = tpu.reciprocal %107 {approx = true} : vector<4x8x1xf32> -> vector<4x8x1xf32>
    %109 = vector.broadcast %108 : vector<4x8x1xf32> to vector<4x8x8xf32>
    %110 = arith.mulf %105, %109 : vector<4x8x8xf32>
    %111 = arith.truncf %110 : vector<4x8x8xf32> to vector<4x8x8xbf16>
    "tpu.trace_start"() <{level = 10 : i32, message = "bqk,bkd->bqd"}> : () -> ()
    %cst_90 = arith.constant dense<0.000000e+00> : vector<4x8x8xf32>
    %112 = tpu.matmul %111, %99, %cst_90 {dimension_numbers = #tpu.dot_dimension_numbers<[2], [1], [1], [2], [0, 0, 0, 1, 1, 2], [0], [0]>} : vector<4x8x8xbf16>, vector<4x8x8xbf16>, vector<4x8x8xf32> -> vector<4x8x8xf32>
    "tpu.trace_stop"() : () -> ()
    %113 = arith.truncf %112 : vector<4x8x8xf32> to vector<4x8x8xbf16>
    %114 = vector.shape_cast %113 : vector<4x8x8xbf16> to vector<4x1x8x8xbf16>
    %115 = vector.extract_strided_slice %114 {offsets = [0, 0, 0, 0], sizes = [1, 1, 8, 8], strides = [1, 1, 1, 1]} : vector<4x1x8x8xbf16> to vector<1x1x8x8xbf16>
    %116 = vector.shape_cast %115 : vector<1x1x8x8xbf16> to vector<1x8x8xbf16>
    %117 = vector.shape_cast %116 : vector<1x8x8xbf16> to vector<8x8xbf16>
    %c0_91 = arith.constant 0 : index
    %c0_92 = arith.constant 0 : index
    %118 = vector.load %arg19[%c0_91, %c0_92] : memref<8x32xbf16, #tpu.memory_space<vmem>>, vector<8x8xbf16>
    tpu.vector_store %arg19[%c0_91, %c0_92], %117 {strides = array<i32>} : memref<8x32xbf16, #tpu.memory_space<vmem>>, vector<8x8xbf16>,
    %119 = vector.extract_strided_slice %114 {offsets = [1, 0, 0, 0], sizes = [1, 1, 8, 8], strides = [1, 1, 1, 1]} : vector<4x1x8x8xbf16> to vector<1x1x8x8xbf16>
    %120 = vector.shape_cast %119 : vector<1x1x8x8xbf16> to vector<1x8x8xbf16>
    %121 = vector.shape_cast %120 : vector<1x8x8xbf16> to vector<8x8xbf16>
    %c0_93 = arith.constant 0 : index
    %c8_94 = arith.constant 8 : index
    %122 = vector.load %arg19[%c0_93, %c8_94] : memref<8x32xbf16, #tpu.memory_space<vmem>>, vector<8x8xbf16>
    tpu.vector_store %arg19[%c0_93, %c8_94], %121 {strides = array<i32>} : memref<8x32xbf16, #tpu.memory_space<vmem>>, vector<8x8xbf16>,
    %123 = vector.extract_strided_slice %114 {offsets = [2, 0, 0, 0], sizes = [1, 1, 8, 8], strides = [1, 1, 1, 1]} : vector<4x1x8x8xbf16> to vector<1x1x8x8xbf16>
    %124 = vector.shape_cast %123 : vector<1x1x8x8xbf16> to vector<1x8x8xbf16>
    %125 = vector.shape_cast %124 : vector<1x8x8xbf16> to vector<8x8xbf16>
    %c0_95 = arith.constant 0 : index
    %c16_96 = arith.constant 16 : index
    %126 = vector.load %arg19[%c0_95, %c16_96] : memref<8x32xbf16, #tpu.memory_space<vmem>>, vector<8x8xbf16>
    tpu.vector_store %arg19[%c0_95, %c16_96], %125 {strides = array<i32>} : memref<8x32xbf16, #tpu.memory_space<vmem>>, vector<8x8xbf16>,
    %127 = vector.extract_strided_slice %114 {offsets = [3, 0, 0, 0], sizes = [1, 1, 8, 8], strides = [1, 1, 1, 1]} : vector<4x1x8x8xbf16> to vector<1x1x8x8xbf16>
    %128 = vector.shape_cast %127 : vector<1x1x8x8xbf16> to vector<1x8x8xbf16>
    %129 = vector.shape_cast %128 : vector<1x8x8xbf16> to vector<8x8xbf16>
    %c0_97 = arith.constant 0 : index
    %c24_98 = arith.constant 24 : index
    %130 = vector.load %arg19[%c0_97, %c24_98] : memref<8x32xbf16, #tpu.memory_space<vmem>>, vector<8x8xbf16>
    tpu.vector_store %arg19[%c0_97, %c24_98], %129 {strides = array<i32>} : memref<8x32xbf16, #tpu.memory_space<vmem>>, vector<8x8xbf16>,
    %c0_99 = arith.constant 0 : index
    %c0_100 = arith.constant 0 : index
    %131 = vector.load %arg19[%c0_99, %c0_100] : memref<8x32xbf16, #tpu.memory_space<vmem>>, vector<8x32xbf16>
    %c0_101 = arith.constant 0 : index
    %c0_102 = arith.constant 0 : index
    %132 = vector.load %arg6[%c0_101, %c0_102] : memref<32x32xbf16, #tpu.memory_space<vmem>>, vector<32x32xbf16>
    %cst_103 = arith.constant dense<0.000000e+00> : vector<8x32xf32>
    %133 = tpu.matmul %131, %132, %cst_103 {dimension_numbers = #tpu.dot_dimension_numbers<[1], [0], [0], [1], [0, 0, 1, 1], [], []>} : vector<8x32xbf16>, vector<32x32xbf16>, vector<8x32xf32> -> vector<8x32xf32>
    %c0_104 = arith.constant 0 : index
    %c0_105 = arith.constant 0 : index
    %134 = vector.load %arg7[%c0_104, %c0_105] : memref<1x32xf32, #tpu.memory_space<vmem>>, vector<1x32xf32>
    %135 = vector.broadcast %134 : vector<1x32xf32> to vector<8x32xf32>
    %136 = arith.addf %133, %135 : vector<8x32xf32>
    %137 = arith.addf %1, %136 : vector<8x32xf32>
    %c0_106 = arith.constant 0 : index
    %c0_107 = arith.constant 0 : index
    %138 = vector.load %arg8[%c0_106, %c0_107] : memref<1x32xf32, #tpu.memory_space<vmem>>, vector<1x32xf32>
    %c0_108 = arith.constant 0 : index
    %c0_109 = arith.constant 0 : index
    %139 = vector.load %arg9[%c0_108, %c0_109] : memref<1x32xf32, #tpu.memory_space<vmem>>, vector<1x32xf32>
    %cst_110 = arith.constant dense<0.000000e+00> : vector<8xf32>
    %140 = vector.multi_reduction <add>, %137, %cst_110 [1] : vector<8x32xf32> to vector<8xf32>
    %141 = vector.shape_cast %140 : vector<8xf32> to vector<8x1xf32>
    %cst_111 = arith.constant 3.200000e+01 : f32
    %142 = vector.broadcast %cst_111 : f32 to vector<8x1xf32>
    %143 = arith.divf %141, %142 : vector<8x1xf32>
    %144 = vector.broadcast %143 : vector<8x1xf32> to vector<8x32xf32>
    %145 = arith.subf %137, %144 : vector<8x32xf32>
    %146 = arith.mulf %145, %145 : vector<8x32xf32>
    %cst_112 = arith.constant dense<0.000000e+00> : vector<8xf32>
    %147 = vector.multi_reduction <add>, %146, %cst_112 [1] : vector<8x32xf32> to vector<8xf32>
    %148 = vector.shape_cast %147 : vector<8xf32> to vector<8x1xf32>
    %cst_113 = arith.constant 3.200000e+01 : f32
    %149 = vector.broadcast %cst_113 : f32 to vector<8x1xf32>
    %150 = arith.divf %148, %149 : vector<8x1xf32>
    %151 = vector.broadcast %143 : vector<8x1xf32> to vector<8x32xf32>
    %152 = arith.subf %137, %151 : vector<8x32xf32>
    %cst_114 = arith.constant 9.99999974E-6 : f32
    %153 = vector.broadcast %cst_114 : f32 to vector<8x1xf32>
    %154 = arith.addf %150, %153 : vector<8x1xf32>
    %155 = math.rsqrt %154 : vector<8x1xf32>
    %156 = vector.broadcast %155 : vector<8x1xf32> to vector<8x32xf32>
    %157 = arith.mulf %152, %156 : vector<8x32xf32>
    %158 = vector.broadcast %138 : vector<1x32xf32> to vector<8x32xf32>
    %159 = arith.mulf %157, %158 : vector<8x32xf32>
    %160 = vector.broadcast %139 : vector<1x32xf32> to vector<8x32xf32>
    %161 = arith.addf %159, %160 : vector<8x32xf32>
    %162 = arith.truncf %161 : vector<8x32xf32> to vector<8x32xbf16>
    %c0_115 = arith.constant 0 : index
    %c0_116 = arith.constant 0 : index
    %163 = vector.load %arg10[%c0_115, %c0_116] : memref<32x128xbf16, #tpu.memory_space<vmem>>, vector<32x128xbf16>
    %cst_117 = arith.constant dense<0.000000e+00> : vector<8x128xf32>
    %164 = tpu.matmul %162, %163, %cst_117 {dimension_numbers = #tpu.dot_dimension_numbers<[1], [0], [0], [1], [0, 0, 1, 1], [], []>} : vector<8x32xbf16>, vector<32x128xbf16>, vector<8x128xf32> -> vector<8x128xf32>
    %c0_118 = arith.constant 0 : index
    %c0_119 = arith.constant 0 : index
    %165 = vector.load %arg11[%c0_118, %c0_119] : memref<1x128xf32, #tpu.memory_space<vmem>>, vector<1x128xf32>
    %166 = vector.broadcast %165 : vector<1x128xf32> to vector<8x128xf32>
    %167 = arith.addf %164, %166 : vector<8x128xf32>
    %cst_120 = arith.constant 5.000000e-01 : f32
    %168 = vector.broadcast %cst_120 : f32 to vector<8x128xf32>
    %169 = arith.mulf %168, %167 : vector<8x128xf32>
    %cst_121 = arith.constant 0.707106769 : f32
    %170 = vector.broadcast %cst_121 : f32 to vector<8x128xf32>
    %171 = arith.mulf %167, %170 : vector<8x128xf32>
    %172 = math.erf %171 : vector<8x128xf32>
    %cst_122 = arith.constant 1.000000e+00 : f32
    %173 = vector.broadcast %cst_122 : f32 to vector<8x128xf32>
    %174 = arith.addf %173, %172 : vector<8x128xf32>
    %175 = arith.mulf %169, %174 : vector<8x128xf32>
    %176 = arith.truncf %175 : vector<8x128xf32> to vector<8x128xbf16>
    %c0_123 = arith.constant 0 : index
    %c0_124 = arith.constant 0 : index
    %177 = vector.load %arg12[%c0_123, %c0_124] : memref<128x32xbf16, #tpu.memory_space<vmem>>, vector<128x32xbf16>
    %cst_125 = arith.constant dense<0.000000e+00> : vector<8x32xf32>
    %178 = tpu.matmul %176, %177, %cst_125 {dimension_numbers = #tpu.dot_dimension_numbers<[1], [0], [0], [1], [0, 0, 1, 1], [], []>} : vector<8x128xbf16>, vector<128x32xbf16>, vector<8x32xf32> -> vector<8x32xf32>
    %c0_126 = arith.constant 0 : index
    %c0_127 = arith.constant 0 : index
    %179 = vector.load %arg13[%c0_126, %c0_127] : memref<1x32xf32, #tpu.memory_space<vmem>>, vector<1x32xf32>
    %180 = vector.broadcast %179 : vector<1x32xf32> to vector<8x32xf32>
    %181 = arith.addf %178, %180 : vector<8x32xf32>
    %182 = arith.addf %137, %181 : vector<8x32xf32>
    %183 = vector.shape_cast %182 : vector<8x32xf32> to vector<1x8x32xf32>
    %c0_128 = arith.constant 0 : index
    %c0_129 = arith.constant 0 : index
    %c0_130 = arith.constant 0 : index
    %184 = vector.load %arg14[%c0_128, %c0_129, %c0_130] : memref<1x8x32xf32, #tpu.memory_space<vmem>>, vector<1x8x32xf32>
    tpu.vector_store %arg14[%c0_128, %c0_129, %c0_130], %183 {strides = array<i32>} : memref<1x8x32xf32, #tpu.memory_space<vmem>>, vector<1x8x32xf32>,
    return
  }
  func.func @transform_0(%arg0: i32) -> (i32, i32, i32) {
    %c0_i32 = arith.constant 0 : i32
    %c0_i32_0 = arith.constant 0 : i32
    %c0_i32_1 = arith.constant 0 : i32
    return %arg0, %c0_i32, %c0_i32_0 : i32, i32, i32
  }
  func.func @transform_1(%arg0: i32) -> (i32, i32) {
    %c0_i32 = arith.constant 0 : i32
    %c0_i32_0 = arith.constant 0 : i32
    %c0_i32_1 = arith.constant 0 : i32
    return %c0_i32, %c0_i32_0 : i32, i32
  }
  func.func @transform_2(%arg0: i32) -> (i32, i32) {
    %c0_i32 = arith.constant 0 : i32
    %c0_i32_0 = arith.constant 0 : i32
    %c0_i32_1 = arith.constant 0 : i32
    return %c0_i32, %c0_i32_0 : i32, i32
  }
  func.func @transform_3(%arg0: i32) -> (i32, i32) {
    %c0_i32 = arith.constant 0 : i32
    %c0_i32_0 = arith.constant 0 : i32
    %c0_i32_1 = arith.constant 0 : i32
    return %c0_i32, %c0_i32_0 : i32, i32
  }
  func.func @transform_4(%arg0: i32) -> (i32, i32) {
    %c0_i32 = arith.constant 0 : i32
    %c0_i32_0 = arith.constant 0 : i32
    %c0_i32_1 = arith.constant 0 : i32
    return %c0_i32, %c0_i32_0 : i32, i32
  }
  func.func @transform_5(%arg0: i32) -> (i32, i32) {
    %c0_i32 = arith.constant 0 : i32
    %c0_i32_0 = arith.constant 0 : i32
    %c0_i32_1 = arith.constant 0 : i32
    return %c0_i32, %c0_i32_0 : i32, i32
  }
  func.func @transform_6(%arg0: i32) -> (i32, i32) {
    %c0_i32 = arith.constant 0 : i32
    %c0_i32_0 = arith.constant 0 : i32
    %c0_i32_1 = arith.constant 0 : i32
    return %c0_i32, %c0_i32_0 : i32, i32
  }
  func.func @transform_7(%arg0: i32) -> (i32, i32) {
    %c0_i32 = arith.constant 0 : i32
    %c0_i32_0 = arith.constant 0 : i32
    %c0_i32_1 = arith.constant 0 : i32
    return %c0_i32, %c0_i32_0 : i32, i32
  }
  func.func @transform_8(%arg0: i32) -> (i32, i32) {
    %c0_i32 = arith.constant 0 : i32
    %c0_i32_0 = arith.constant 0 : i32
    %c0_i32_1 = arith.constant 0 : i32
    return %c0_i32, %c0_i32_0 : i32, i32
  }
  func.func @transform_9(%arg0: i32) -> (i32, i32) {
    %c0_i32 = arith.constant 0 : i32
    %c0_i32_0 = arith.constant 0 : i32
    %c0_i32_1 = arith.constant 0 : i32
    return %c0_i32, %c0_i32_0 : i32, i32
  }
  func.func @transform_10(%arg0: i32) -> (i32, i32) {
    %c0_i32 = arith.constant 0 : i32
    %c0_i32_0 = arith.constant 0 : i32
    %c0_i32_1 = arith.constant 0 : i32
    return %c0_i32, %c0_i32_0 : i32, i32
  }
  func.func @transform_11(%arg0: i32) -> (i32, i32) {
    %c0_i32 = arith.constant 0 : i32
    %c0_i32_0 = arith.constant 0 : i32
    %c0_i32_1 = arith.constant 0 : i32
    return %c0_i32, %c0_i32_0 : i32, i32
  }
  func.func @transform_12(%arg0: i32) -> (i32, i32) {
    %c0_i32 = arith.constant 0 : i32
    %c0_i32_0 = arith.constant 0 : i32
    %c0_i32_1 = arith.constant 0 : i32
    return %c0_i32, %c0_i32_0 : i32, i32
  }
  func.func @transform_13(%arg0: i32) -> (i32, i32, i32) {
    %c0_i32 = arith.constant 0 : i32
    %c0_i32_0 = arith.constant 0 : i32
    %c0_i32_1 = arith.constant 0 : i32
    return %arg0, %c0_i32, %c0_i32_0 : i32, i32, i32
  }
}

</mosaic_0001>

<bundles_post_ra>
// kernel: tpu_custom_call.1
= control target key start
LH: loop header
LB: loop body
LE: loop exit
PB: predicated region body
PF: predicated region fallthrough
CT: control target
= control target key end

     0   :  { %s2113_s0 = inlined_call_operand.vmem [shape: f32[2,8,32], index: 0, kind: input, shape index: {}]   ;;  %s2114_s1 = inlined_call_operand.vmem [shape: f32[1,32], index: 1, kind: input, shape index: {}]   ;;  %s2115_s2 = inlined_call_operand.vmem [shape: f32[1,32], index: 2, kind: input, shape index: {}]   ;;  %s2116_s3 = inlined_call_operand.vmem [shape: bf16[32,96], index: 3, kind: input, shape index: {}]   ;;  %s2117_s4 = inlined_call_operand.vmem [shape: f32[1,96], index: 4, kind: input, shape index: {}]   ;;  %s2118_s5 = inlined_call_operand.vmem [shape: bf16[32,32], index: 5, kind: input, shape index: {}]   ;;  %s2119_s6 = inlined_call_operand.vmem [shape: f32[1,32], index: 6, kind: input, shape index: {}]   ;;  %s2120_s7 = inlined_call_operand.vmem [shape: f32[1,32], index: 7, kind: input, shape index: {}]   ;;  %s2121_s8 = inlined_call_operand.vmem [shape: f32[1,32], index: 8, kind: input, shape index: {}]   ;;  %s2122_s9 = inlined_call_operand.vmem [shape: bf16[32,128], index: 9, kind: input, shape index: {}]   ;;  %s2123_s10 = inlined_call_operand.vmem [shape: f32[1,128], index: 10, kind: input, shape index: {}]   ;;  %s2124_s11 = inlined_call_operand.vmem [shape: bf16[128,32], index: 11, kind: input, shape index: {}]   ;;  %s2125_s12 = inlined_call_operand.vmem [shape: f32[1,32], index: 12, kind: input, shape index: {}]   ;;  %s2126_s13 = inlined_call_operand.hbm [shape: f32[2,8,32], index: 13, kind: output, shape index: {}]  }
   0x1   :  { %2127 = sst [smem:[#allocation10_spill]] %s2113_s0 }
   0x2   :  { %2128 = sst [smem:[#allocation11_spill]] %s2114_s1 }
   0x3   :  { %2129 = sst [smem:[#allocation12_spill]] %s2115_s2 }
   0x4   :  { %18 = vsyncpa [#allocation8], 0 }
   0x5   :  { %20 = vsyncpa [#allocation8 + $0x1], 0  ;;  %s1847_s25 = smov 0   ;;  %s1849_s26 = smov 0  }
   0x6   :  { %s1851_s27 = smov 0   ;;  %s1853_s28 = smov 0  }
   0x7 LB: > { %s1868_s29 = sadd.s32 4294967295, %s1758_s28   ;;  %s1432_s30 = sadd.s32 4294967294, %s1758_s28   ;;  %s1758_s28 = sphi %s1853_s28, %s2138_s28   ;;  %s1754_s27 = sphi %s1851_s27, %s2137_s27   ;;  %s1750_s26 = sphi %s1849_s26, %s2136_s26   ;;  %s1746_s25 = sphi %s1847_s25, %s2135_s25  }
   0x8   : > { %s1872_s14 = sadd.s32 1, %s1758_s28   ;;  %s311_s15 = sadd.s32 1, %s1754_s27 }
   0x9   : > { %s308_s16 = ssub.s32 %s1758_s28, %s1872_s14  ;;  %p321_p0 = scmp.ne.s32.totalorder %s1754_s27, %s1750_s26 }
   0xa   : > { %p309_p1 = scmp.eq.s32.totalorder %s308_s16, 0  ;;  %p322_p2 = scmp.eq.s32.totalorder %s1868_s29, 1 }
   0xb   : > { %p327_p3 = scmp.ne.s32.totalorder %s1750_s26, %s1746_s25  ;;  %p328_p4 = scmp.eq.s32.totalorder %s1432_s30, 1 }
   0xc   : > { %s1883_s17 = scalar_select %p309_p1, %s1754_s27, %s311_s15  }
   0xd   : > { %p1885_p5 = por %p322_p2, %p321_p0  ;;  %p1889_p6 = por %p328_p4, %p327_p3 }
   0xe   : > { %p1435_p7 = scmp.ge.s32.totalorder %s1758_s28, 1  ;;  %p389_p8 = scmp.lt.s32.totalorder %s1758_s28, 3 }
  0x10   : > { %p390_p9 = pnand %p1435_p7, %p389_p8 }
  0x11   : > { %p432_p10 = scmp.lt.s32.totalorder (!%p390_p9), %s1868_s29, 1  ;;  %s2132_s0 = sld [smem:[#allocation10_spill]] (!%p390_p9) }
  0x12   : > { %393 = sbr.rel (%p390_p9) target bundleno = 2458 (0x99a), region = 72  ;;  %s2133_s1 = sld [smem:[#allocation11_spill]] (!%p390_p9) }
  0x13   : > { %s2134_s2 = sld [smem:[#allocation12_spill]] (!%p390_p9)  ;;  %s1762_s16 = smov (!%p390_p9), 80  }
  0x14   : > { %s1765_s22 = smov (!%p390_p9), 120   ;;  %s1766_s23 = smov (!%p390_p9), 72  }
  0x15   : > { %s1768_s30 = smov (!%p390_p9), 104   ;;  %s1769_s15 = smov (!%p390_p9), 64  }
  0x17   : > { %s433_s20 = scalar_select %p432_p10, %s1868_s29, 1  ;;  %vm440_vm0 = vcmask 261120   ;;  %v1662_v7 = vld [vmem:[%s2116_s3 + $0x8] sm:$0xff]   ;;  %v1760_v8 = vmov 0.0   ;;  %vm1761_vm1 = vmmov 0   ;;  %v1663_v9 = vld [vmem:[%s2116_s3] sm:$0xff]  }
  0x18   : > { %1515 = vmatprep.subr.bf16.mxu0 %v1760_v8  ;;  %1519 = vmatprep.mubr.msk.bf16.mxu0 %vm1761_vm1, %v1760_v8  ;;  %v1438_v14 = vld [vmem:[%s2133_s1] ss:$0 sm:$0xff]  ;;  %vm537_vm2 = vcmask 781312   ;;  %vm540_vm3 = vcmask 60416   ;;  %vm629_vm4 = vcmask 64512   ;;  %vm865_vm5 = vcmask 1043456  }
  0x19   : > { %s1437_s21 = sshll.u32 %s433_s20, 3  ;;  %1516 = vmatpush3.bf16.msra.mxu0 %v1662_v7  ;;  %1535 = vmatprep.subr.bf16.mxu1 %v1760_v8  ;;  %v1439_v16 = vld [vmem:[%s2134_s2] ss:$0 sm:$0xff]  ;;  %s1763_s20 = smov 96   ;;  %vm1058_vm6 = vcmask 126016   ;;  %vm1066_vm7 = vcmask 191616  }
  0x1a   : > { %s435_s24 = scalar_lea.vmem %s2132_s0, %s1437_s21  ;;  %1517 = vmatprep.subr.bf16.mxu0 %v1760_v8  ;;  %1537 = vmatprep.mubr.msk.bf16.mxu1 %vm1761_vm1, %v1760_v8  ;;  %v1440_v20 = vld [vmem:[%s2117_s4] ss:$0 sm:$0xff]  ;;  %s1764_s21 = smov 88   ;;  %vm1074_vm8 = vcmask 257216  }
  0x1b   : > { %v1900_v0 = vld [vmem:[%s435_s24] sm:$0xff]  ;;  %s1767_s24 = smov 112  }
  0x1c   : > { %v441_v1 = vsel %vm440_vm0, %v1900_v0, 0.0 }
  0x1d   : > { %442 = vadd.xlane.f32.xlu0 %v441_v1  ;;  %1518 = vmatpush3.bf16.msra.mxu0 %v1663_v9 }
  0x1e   : > { %1523 = vmatprep.subr.bf16.mxu0 %v1760_v8 }
  0xa6   : > { %v443_v2 = vpop.xlane.xlu0 %442 }
  0xa7   : > { %v445_v3 = vmul.f32 0.03125, %v443_v2 }
  0xa9   : > { %v446_v4 = vsub.f32 %v1900_v0, %v445_v3 }
  0xab   : > { %v447_v5 = vmul.f32 %v446_v4, %v446_v4 }
  0xad   : > { %v448_v6 = vsel %vm440_vm0, %v447_v5, 0.0 }
  0xae   : > { %449 = vadd.xlane.f32.xlu0 %v448_v6 }
 0x137   : > { %v450_v10 = vpop.xlane.xlu0 %449 }
 0x138   : > { %v451_v11 = vmul.f32 0.03125, %v450_v10 }
 0x13a   : > { %v452_v12 = vadd.f32 1e-05, %v451_v11 }
 0x13c   : > { %1676 = vrsqrt.f32 %v452_v12 }
 0x149   : > { %v1677_v13 = vpop.eup %1676 }
 0x14a   : > { %v454_v15 = vmul.f32 %v1677_v13, %v446_v4 }
 0x14c   : > { %v461_v17 = vmul.f32 %v1438_v14, %v454_v15 }
 0x14e   : > { %v468_v18 = vadd.f32 %v1439_v16, %v461_v17 }
 0x150   : > { %v469_v19 = vpack.c.bf16 %v468_v18, %v468_v18 }
 0x152   : > { %1520 = vmatmul.mubr.msk.bf16.vlgmr.msra.gmra.mxu0 %vm440_vm0, %v469_v19 }
 0x153   : > { %1525 = vmatprep.mubr.msk.bf16.mxu0 %vm1761_vm1, %v1760_v8 }
 0x212   : > { %v530_v21 = vpop.f32.mrf.mxu0 }
 0x213   : > { %v531_v22 = vadd.f32 %v1440_v20, %v530_v21 }
 0x214   : > { %v1521_v23 = vpop.f32.mrf.mxu0 }
 0x215   : > { %v536_v24 = vpack.c.bf16 %v531_v22, %v531_v22 }
 0x216   : > { %v533_v25 = vpop.f32.mrf.mxu0 }
 0x217   : > { %538 = vst.msk [vmem:[#allocation2] sm:$0xf] %vm537_vm2, %v536_v24 }
 0x218   : > { %v1522_v26 = vpop.f32.mrf.mxu0 }
 0x21e   : > { %v539_v27 = vld [vmem:[#allocation2] sm:$0xf] }
 0x21f   : > { %v582_v28 = vld [vmem:[#allocation2] sm:$0xf]  ;;  %541 = vst.msk [vmem:[#allocation3] sm:$0xf] %vm540_vm3, %v539_v27 }
 0x220   : > { %v542_v29 = vld [vmem:[#allocation2] sm:$0xf]  ;;  %584 = vrot.lane.b32.xlu0 %v582_v28, %s1762_s16  ;;  %s1770_s16 = smov 48  }
 0x221   : > { %544 = vrot.lane.b32.xlu1 %v542_v29, %s1763_s20  ;;  %v561_v30 = vld [vmem:[#allocation2] sm:$0xf]  ;;  %s1771_s20 = smov 40  }
 0x222   : > { %v554_v31 = vld [vmem:[#allocation2] sm:$0xf] }
 0x223   : > { %v603_v32 = vld [vmem:[#allocation2] sm:$0xf] }
 0x224   : > { %v575_v33 = vld [vmem:[#allocation2] sm:$0xf] }
 0x225   : > { %563 = vrot.lane.b32.xlu1 %v561_v30, %s1764_s21  ;;  %v596_v34 = vld [vmem:[#allocation2] sm:$0xf]  ;;  %s1772_s21 = smov 56  }
 0x226   : > { %v617_v46 = vld [vmem:[#allocation3] sm:$0xf]  ;;  %v548_v12 = vld [vmem:[#allocation2] sm:$0xf] }
 0x229   : > { %556 = vrot.lane.b32.xlu1 %v554_v31, %s1765_s22  ;;  %s1773_s22 = smov 16  }
 0x22d   : > { %605 = vrot.lane.b32.xlu1 %v603_v32, %s1766_s23 }
 0x231   : > { %577 = vrot.lane.b32.xlu1 %v575_v33, %s1767_s24 }
 0x235   : > { %598 = vrot.lane.b32.xlu1 %v596_v34, %s1768_s30  ;;  %s429_s30 = sand.u32 1, %s1750_s26  }
 0x292   : > { %v585_v35 = vpop.permute.xlu0 %584 }
 0x293   : > { %v545_v36 = vpop.permute.xlu1 %544  ;;  %588 = vst.msk [vmem:[#allocation4 + $0x8] sm:$0xf] %vm540_vm3, %v585_v35 }
 0x294   : > { %547 = vst.msk [vmem:[#allocation4] sm:$0xf] %vm540_vm3, %v545_v36  ;;  %v589_v36 = vld [vmem:[#allocation2] sm:$0xf] }
 0x297   : > { %v564_v37 = vpop.permute.xlu1 %563 }
 0x298   : > { %567 = vst.msk [vmem:[#allocation4 + $0x4] sm:$0xf] %vm540_vm3, %v564_v37  ;;  %v610_v37 = vld [vmem:[#allocation2] sm:$0xf] }
 0x29a   : > { %v623_v40 = vld [vmem:[#allocation4 + $0x8] sm:$0xf] }
 0x29b   : > { %v557_v38 = vpop.permute.xlu1 %556  ;;  %v621_v39 = vld [vmem:[#allocation4] sm:$0xf]  ;;  %v726_v42 = vsel %vm629_vm4, %v623_v40, 0 }
 0x29c   : > { %560 = vst.msk [vmem:[#allocation3 + $0x4] sm:$0xf] %vm540_vm3, %v557_v38  ;;  %v634_v41 = vsel %vm629_vm4, %v621_v39, 0  ;;  %1536 = vmatpush3.bf16.xpose.msra.mxu1 %v726_v42  ;;  %v568_v38 = vld [vmem:[#allocation2] sm:$0xf] }
 0x29d   : > { %1524 = vmatpush3.bf16.xpose.msra.mxu0 %v634_v41  ;;  %1547 = vmatprep.subr.bf16.mxu1 %v1760_v8 }
 0x29e   : > { %1529 = vmatprep.subr.bf16.mxu0 %v1760_v8 }
 0x29f   : > { %v606_v43 = vpop.permute.xlu1 %605  ;;  %v622_v44 = vld [vmem:[#allocation4 + $0x4] sm:$0xf] }
 0x2a0   : > { %609 = vst.msk [vmem:[#allocation4 + $0xc] sm:$0xf] %vm540_vm3, %v606_v43  ;;  %v680_v47 = vsel %vm629_vm4, %v622_v44, 0 }
 0x2a3   : > { %v578_v45 = vpop.permute.xlu1 %577  ;;  %v618_v50 = vld [vmem:[#allocation3 + $0x4] sm:$0xf] }
 0x2a4   : > { %581 = vst.msk [vmem:[#allocation3 + $0x8] sm:$0xf] %vm540_vm3, %v578_v45  ;;  %1526 = vmatmul.mubr.msk.bf16.vlgmr.msra.gmra.mxu0 %vm629_vm4, %v617_v46 }
 0x2a5   : > { %1530 = vmatpush3.bf16.xpose.msra.mxu0 %v680_v47  ;;  %1531 = vmatprep.mubr.msk.bf16.mxu0 %vm1761_vm1, %v1760_v8 }
 0x2a6   : > { %1541 = vmatprep.subr.bf16.mxu0 %v1760_v8 }
 0x2a7   : > { %v599_v48 = vpop.permute.xlu1 %598  ;;  %v624_v49 = vld [vmem:[#allocation4 + $0xc] sm:$0xf] }
 0x2a8   : > { %602 = vst.msk [vmem:[#allocation3 + $0xc] sm:$0xf] %vm540_vm3, %v599_v48  ;;  %v772_v52 = vsel %vm629_vm4, %v624_v49, 0 }
 0x2ab   : > { %v619_v51 = vld [vmem:[#allocation3 + $0x8] sm:$0xf] }
 0x2ac   : > { %1532 = vmatmul.mubr.msk.bf16.vlgmr.msra.gmra.mxu0 %vm629_vm4, %v618_v50  ;;  %1538 = vmatmul.mubr.msk.bf16.vlgmr.msra.gmra.mxu1 %vm629_vm4, %v619_v51 }
 0x2ad   : > { %1542 = vmatpush3.bf16.xpose.msra.mxu0 %v772_v52  ;;  %1543 = vmatprep.mubr.msk.bf16.mxu0 %vm1761_vm1, %v1760_v8 }
 0x2ae   : > { %1549 = vmatprep.mubr.msk.bf16.mxu1 %vm1761_vm1, %v1760_v8  ;;  %1553 = vmatprep.subr.bf16.mxu0 %v1760_v8 }
 0x2af   : > { %v620_v53 = vld [vmem:[#allocation3 + $0xc] sm:$0xf] }
 0x2b4   : > { %1544 = vmatmul.mubr.msk.bf16.vlgmr.msra.gmra.mxu0 %vm629_vm4, %v620_v53 }
 0x2b5   : > { %1555 = vmatprep.mubr.msk.bf16.mxu0 %vm1761_vm1, %v1760_v8 }
 0x364   : > { %v670_v54 = vpop.f32.mrf.mxu0 }
 0x365   : > { %v814_v55 = vsel %vm629_vm4, %v670_v54, -inf }
 0x366   : > { %815 = vmax.xlane.f32.xlu1 %v814_v55  ;;  %v1527_v56 = vpop.f32.mrf.mxu0 }
 0x368   : > { %v673_v57 = vpop.f32.mrf.mxu0 }
 0x36a   : > { %v1528_v58 = vpop.f32.mrf.mxu0 }
 0x36c   : > { %v716_v59 = vpop.f32.mrf.mxu0  ;;  %v762_v60 = vpop.f32.mrf.mxu1 }
 0x36d   : > { %v820_v61 = vsel %vm629_vm4, %v762_v60, -inf  ;;  %v817_v62 = vsel %vm629_vm4, %v716_v59, -inf }
 0x36e   : > { %v1539_v63 = vpop.f32.mrf.mxu1  ;;  %821 = vmax.xlane.f32.xlu1 %v820_v61  ;;  %818 = vmax.xlane.f32.xlu0 %v817_v62  ;;  %v1533_v1 = vpop.f32.mrf.mxu0 }
 0x370   : > { %v719_v2 = vpop.f32.mrf.mxu0  ;;  %v765_v3 = vpop.f32.mrf.mxu1 }
 0x372   : > { %v1534_v4 = vpop.f32.mrf.mxu0  ;;  %v1540_v5 = vpop.f32.mrf.mxu1 }
 0x374   : > { %v808_v6 = vpop.f32.mrf.mxu0 }
 0x375   : > { %v823_v7 = vsel %vm629_vm4, %v808_v6, -inf }
 0x376   : > { %824 = vmax.xlane.f32.xlu0 %v823_v7  ;;  %v1545_v9 = vpop.f32.mrf.mxu0 }
 0x378   : > { %v811_v10 = vpop.f32.mrf.mxu0 }
 0x37a   : > { %v1546_v11 = vpop.f32.mrf.mxu0 }
 0x37b   : > { %v1664_v11 = vld [vmem:[%s2118_s5 + $0x8] sm:$0xff]  }
 0x37f   : > { %550 = vrot.lane.b32.xlu1 %v548_v12, %s1769_s15  ;;  %s1436_s15 = sshll.u32 %s429_s30, 3 }
 0x3ef   : > { %v816_v13 = vpop.xlane.xlu1 %815 }
 0x3f0   : > { %v826_v14 = vsub.f32 %v670_v54, %v816_v13 }
 0x3f2   : > { %v830_v15 = vmul.f32 1.442695, %v826_v14  ;;  %v1665_v14 = vld [vmem:[%s2118_s5] sm:$0xff]  }
 0x3f4   : > { %1678 = vpow2.f32 %v830_v15 }
 0x3f7   : > { %v822_v16 = vpop.xlane.xlu1 %821  ;;  %v819_v17 = vpop.xlane.xlu0 %818 }
 0x3f8   : > { %v828_v18 = vsub.f32 %v762_v60, %v822_v16  ;;  %v827_v19 = vsub.f32 %v716_v59, %v819_v17 }
 0x3fa   : > { %v834_v20 = vmul.f32 1.442695, %v828_v18  ;;  %v832_v21 = vmul.f32 1.442695, %v827_v19 }
 0x3fb   : > { %v551_v22 = vpop.permute.xlu1 %550 }
 0x3fc   : > { %1680 = vpow2.f32 %v834_v20  ;;  %553 = vst.msk [vmem:[#allocation5] sm:$0xf] %vm540_vm3, %v551_v22 }
 0x3fd   : > { %1682 = vpow2.f32 %v832_v21 }
 0x3ff   : > { %v825_v23 = vpop.xlane.xlu0 %824 }
 0x400   : > { %v829_v24 = vsub.f32 %v808_v6, %v825_v23 }
 0x401   : > { %v1679_v25 = vpop.eup %1678 }
 0x402   : > { %v836_v26 = vmul.f32 1.442695, %v829_v24  ;;  %v838_v27 = vsel %vm629_vm4, %v1679_v25, 0.0 }
 0x403   : > { %839 = vadd.xlane.f32.xlu1 %v838_v27  ;;  %v625_v28 = vld [vmem:[#allocation5] sm:$0xf] }
 0x404   : > { %1684 = vpow2.f32 %v836_v26  ;;  %v867_v29 = vsel %vm865_vm5, %v625_v28, 0  ;;  %v1455_v28 = vld [vmem:[%s2119_s6] ss:$0 sm:$0xff] }
 0x405   : > { %1548 = vmatpush3.bf16.msra.mxu1 %v867_v29 }
 0x406   : > { %1559 = vmatprep.subr.bf16.mxu1 %v1760_v8 }
 0x409   : > { %v1681_v30 = vpop.eup %1680 }
 0x40a   : > { %v1683_v31 = vpop.eup %1682  ;;  %v844_v32 = vsel %vm629_vm4, %v1681_v30, 0.0 }
 0x40b   : > { %845 = vadd.xlane.f32.xlu1 %v844_v32  ;;  %v841_v33 = vsel %vm629_vm4, %v1683_v31, 0.0 }
 0x40c   : > { %842 = vadd.xlane.f32.xlu0 %v841_v33 }
 0x411   : > { %v1685_v34 = vpop.eup %1684 }
 0x412   : > { %v847_v35 = vsel %vm629_vm4, %v1685_v34, 0.0 }
 0x413   : > { %848 = vadd.xlane.f32.xlu0 %v847_v35 }
 0x41c   : > { %591 = vrot.lane.b32.xlu1 %v589_v36, %s1770_s16  ;;  %s1774_s16 = smov 8  }
 0x420   : > { %612 = vrot.lane.b32.xlu1 %v610_v37, %s1771_s20  ;;  %s1775_s20 = smov 24  }
 0x429   : > { %570 = vrot.lane.b32.xlu0 %v568_v38, %s1772_s21  ;;  %s1475_s21 = sshll.u32 %s1868_s29, 7  ;;  %s1360_s29 = scalar_lea.sflag [#allocation8], %s429_s30 }
 0x42a   : > { %s2071_s1 = scalar_lea.hbm %s2126_s13, %s1475_s21 }
 0x48c   : > { %v840_v39 = vpop.xlane.xlu1 %839 }
 0x48d   : > { %1686 = vrcp.f32 %v840_v39 }
 0x494   : > { %v846_v40 = vpop.xlane.xlu1 %845 }
 0x495   : > { %1688 = vrcp.f32 %v846_v40  ;;  %v843_v41 = vpop.xlane.xlu0 %842 }
 0x496   : > { %1690 = vrcp.f32 %v843_v41  ;;  %v1666_v41 = vld [vmem:[%s2122_s9 + $0x8] sm:$0xff]  }
 0x498   : > { %v592_v42 = vpop.permute.xlu1 %591 }
 0x499   : > { %595 = vst.msk [vmem:[#allocation5 + $0x8] sm:$0xf] %vm540_vm3, %v592_v42  ;;  %v1668_v42 = vld [vmem:[%s2124_s11 + $0x38] sm:$0xff]  }
 0x49a   : > { %v1687_v43 = vpop.eup %1686 }
 0x49b   : > { %v854_v44 = vmul.f32 %v1687_v43, %v1679_v25  ;;  %v1669_v43 = vld [vmem:[%s2124_s11 + $0x30] sm:$0xff]  }
 0x49c   : > { %v613_v45 = vpop.permute.xlu1 %612  ;;  %v849_v46 = vpop.xlane.xlu0 %848 }
 0x49d   : > { %616 = vst.msk [vmem:[#allocation5 + $0xc] sm:$0xf] %vm540_vm3, %v613_v45  ;;  %v858_v47 = vpack.c.bf16 %v854_v44, %v854_v44  ;;  %1692 = vrcp.f32 %v849_v46 }
 0x49f   : > { %1550 = vmatmul.mubr.msk.bf16.vlgmr.msra.gmra.mxu1 %vm629_vm4, %v858_v47 }
 0x4a0   : > { %v571_v48 = vpop.permute.xlu0 %570  ;;  %v627_v49 = vld [vmem:[#allocation5 + $0x8] sm:$0xf]  ;;  %1561 = vmatprep.mubr.msk.bf16.mxu1 %vm1761_vm1, %v1760_v8 }
 0x4a1   : > { %574 = vst.msk [vmem:[#allocation5 + $0x4] sm:$0xf] %vm540_vm3, %v571_v48  ;;  %v959_v50 = vsel %vm865_vm5, %v627_v49, 0  ;;  %v1459_v48 = vld [vmem:[%s2120_s7] ss:$0 sm:$0xff] }
 0x4a2   : > { %v1689_v51 = vpop.eup %1688  ;;  %1560 = vmatpush3.bf16.msra.mxu1 %v959_v50  ;;  %v1460_v50 = vld [vmem:[%s2121_s8] ss:$0 sm:$0xff] }
 0x4a3   : > { %v856_v52 = vmul.f32 %v1689_v51, %v1681_v30  ;;  %1571 = vmatprep.subr.bf16.mxu1 %v1760_v8  ;;  %v1691_v53 = vpop.eup %1690 }
 0x4a4   : > { %v855_v55 = vmul.f32 %v1691_v53, %v1683_v31  ;;  %v628_v58 = vld [vmem:[#allocation5 + $0xc] sm:$0xf] }
 0x4a5   : > { %v860_v54 = vpack.c.bf16 %v856_v52, %v856_v52  ;;  %v1005_v61 = vsel %vm865_vm5, %v628_v58, 0  ;;  %v1674_v58 = vld [vmem:[%s2124_s11 + $0x8] sm:$0xff]  }
 0x4a6   : > { %v859_v59 = vpack.c.bf16 %v855_v55, %v855_v55  ;;  %v1671_v55 = vld [vmem:[%s2124_s11 + $0x20] sm:$0xff]  }
 0x4a7   : > { %1562 = vmatmul.mubr.msk.bf16.vlgmr.msra.gmra.mxu1 %vm629_vm4, %v860_v54  ;;  %v1670_v54 = vld [vmem:[%s2124_s11 + $0x28] sm:$0xff]  }
 0x4a8   : > { %v626_v56 = vld [vmem:[#allocation5 + $0x4] sm:$0xf]  ;;  %1575 = vmatprep.mubr.msk.bf16.mxu1 %vm1761_vm1, %v1760_v8  ;;  %1572 = vmatpush3.bf16.msra.mxu1 %v1664_v11 }
 0x4a9   : > { %v913_v57 = vsel %vm865_vm5, %v626_v56, 0  ;;  %1573 = vmatprep.subr.bf16.mxu1 %v1760_v8  ;;  %v1672_v56 = vld [vmem:[%s2124_s11 + $0x18] sm:$0xff]  }
 0x4aa   : > { %1554 = vmatpush3.bf16.msra.mxu0 %v913_v57  ;;  %v1693_v60 = vpop.eup %1692  ;;  %v1673_v57 = vld [vmem:[%s2124_s11 + $0x10] sm:$0xff]  }
 0x4ab   : > { %1565 = vmatprep.subr.bf16.mxu0 %v1760_v8  ;;  %v857_v62 = vmul.f32 %v1693_v60, %v1685_v34  ;;  %v1461_v60 = vld [vmem:[%s2123_s10] ss:$0 sm:$0xff] }
 0x4ac   : > { %1574 = vmatpush3.bf16.msra.mxu1 %v1665_v14 }
 0x4ad   : > { %1556 = vmatmul.mubr.msk.bf16.vlgmr.msra.gmra.mxu0 %vm629_vm4, %v859_v59  ;;  %v861_v63 = vpack.c.bf16 %v857_v62, %v857_v62  ;;  %1587 = vmatprep.subr.bf16.mxu1 %v1760_v8  ;;  %v1675_v59 = vld [vmem:[%s2124_s11] sm:$0xff]  }
 0x4ae   : > { %1566 = vmatpush3.bf16.msra.mxu0 %v1005_v61  ;;  %1567 = vmatprep.mubr.msk.bf16.mxu0 %vm1761_vm1, %v1760_v8 }
 0x4af   : > { %1579 = vmatprep.subr.bf16.mxu0 %v1760_v8 }
 0x4b5   : > { %1568 = vmatmul.mubr.msk.bf16.vlgmr.msra.gmra.mxu0 %vm629_vm4, %v861_v63 }
 0x4b6   : > { %1583 = vmatprep.mubr.msk.bf16.mxu0 %vm1761_vm1, %v1760_v8  ;;  %1580 = vmatpush3.bf16.msra.mxu0 %v1666_v41 }
 0x4b7   : > { %1581 = vmatprep.subr.bf16.mxu0 %v1760_v8 }
 0x55f   : > { %v903_v1 = vpop.f32.mrf.mxu1 }
 0x560   : > { %v1047_v2 = vpack.c.bf16 %v903_v1, %v903_v1 }
 0x561   : > { %v1551_v3 = vpop.f32.mrf.mxu1 }
 0x562   : > { %1051 = vst.msk [vmem:[#allocation6] sm:$0xf] %vm540_vm3, %v1047_v2 }
 0x563   : > { %v906_v4 = vpop.f32.mrf.mxu1 }
 0x565   : > { %v1552_v5 = vpop.f32.mrf.mxu1 }
 0x567   : > { %v995_v6 = vpop.f32.mrf.mxu1 }
 0x568   : > { %v1479_v7 = vpack.c.bf16 %v995_v6, %v995_v6 }
 0x569   : > { %v1563_v9 = vpop.f32.mrf.mxu1 }
 0x56a   : > { %1063 = vrot.lane.b32.xlu1 %v1479_v7, %s1773_s22  ;;  %v1465_v9 = vld [vmem:[%s2125_s12] ss:$0 sm:$0xff]  ;;  %s431_s22 = scalar_lea.vmem [#allocation7], %s1436_s15 }
 0x56b   : > { %v998_v10 = vpop.f32.mrf.mxu1  ;;  %s1373_s23 = sshll.u32 %s431_s22, 4  ;;  %s2073_s23 = int_to_ptr.vmem [resolvable:$true] %s1373_s23 }
 0x56c   : > { %s1698_s15 = scalar_lea.vmem %s2073_s23, 128 }
 0x56d   : > { %v949_v12 = vpop.f32.mrf.mxu0  ;;  %v1564_v13 = vpop.f32.mrf.mxu1  ;;  %p1699_p11 = scmp.ne.s32.totalorder %s2073_s23, %s1698_s15 }
 0x56e   : > { %v1478_v15 = vpack.c.bf16 %v949_v12, %v949_v12 }
 0x56f   : > { %v1557_v16 = vpop.f32.mrf.mxu0  ;;  %p1700_p12 = pnand %p1699_p11, %p1885_p5 }
 0x570   : > { %1055 = vrot.lane.b32.xlu0 %v1478_v15, %s1774_s16  ;;  %s1776_s16 = smov [#allocation7]  }
 0x571   : > { %v952_v17 = vpop.f32.mrf.mxu0  ;;  %p1701_p13 = pneg %p1700_p12 }
 0x573   : > { %v1558_v18 = vpop.f32.mrf.mxu0 }
 0x575   : > { %v1041_v19 = vpop.f32.mrf.mxu0 }
 0x576   : > { %v1480_v20 = vpack.c.bf16 %v1041_v19, %v1041_v19 }
 0x577   : > { %v1569_v21 = vpop.f32.mrf.mxu0 }
 0x578   : > { %1071 = vrot.lane.b32.xlu0 %v1480_v20, %s1775_s20  ;;  %s1702_s20 = sshll.u32 %s1776_s16, 4  ;;  %s1703_s20 = int_to_ptr.vmem [resolvable:$false] %s1702_s20 }
 0x579   : > { %v1044_v22 = vpop.f32.mrf.mxu0  ;;  %s1704_s0 = scalar_lea.vmem %s1703_s20, 256  ;;  %p1705_p0 = scmp.lt.s32.totalorder %s2073_s23, %s1703_s20 }
 0x57a   : > { %p1706_p1 = scmp.lt.s32.totalorder %s1704_s0, %s1698_s15 }
 0x57b   : > { %v1570_v23 = vpop.f32.mrf.mxu0 }
 0x57c   : > { %p1707_p2 = por %p1706_p1, %p1705_p0 }
 0x57e   : > { %p1708_p3 = pnand %p1707_p2, %p1701_p13 }
 0x5dc   : > { %v1064_v25 = vpop.permute.xlu1 %1063 }
 0x5e2   : > { %v1056_v24 = vpop.permute.xlu0 %1055 }
 0x5e3   : > { %1059 = vst.msk [vmem:[#allocation6] sm:$0xf] %vm1058_vm6, %v1056_v24 }
 0x5e4   : > { %1067 = vst.msk [vmem:[#allocation6] sm:$0xf] %vm1066_vm7, %v1064_v25 }
 0x5ea   : > { %v1072_v26 = vpop.permute.xlu0 %1071 }
 0x5eb   : > { %1075 = vst.msk [vmem:[#allocation6] sm:$0xf] %vm1074_vm8, %v1072_v26 }
 0x5f2   : > { %v1076_v27 = vld [vmem:[#allocation6] sm:$0xf] }
 0x5f3   : > { %1576 = vmatmul.mubr.msk.bf16.vlgmr.msra.gmra.mxu1 %vm440_vm0, %v1076_v27 }
 0x5f4   : > { %1603 = vmatprep.mubr.msk.bf16.mxu1 %vm1761_vm1, %v1760_v8  ;;  %1588 = vmatpush3.bf16.msra.mxu1 %v1668_v42 }
 0x5f5   : > { %1589 = vmatprep.subr.bf16.mxu1 %v1760_v8 }
 0x5f8   : > { %1590 = vmatpush3.bf16.msra.mxu1 %v1669_v43 }
 0x5f9   : > { %1591 = vmatprep.subr.bf16.mxu1 %v1760_v8 }
 0x5fc   : > { %1592 = vmatpush3.bf16.msra.mxu1 %v1670_v54 }
 0x5fd   : > { %1593 = vmatprep.subr.bf16.mxu1 %v1760_v8 }
 0x600   : > { %1594 = vmatpush3.bf16.msra.mxu1 %v1671_v55 }
 0x601   : > { %1595 = vmatprep.subr.bf16.mxu1 %v1760_v8 }
 0x604   : > { %1596 = vmatpush3.bf16.msra.mxu1 %v1672_v56 }
 0x605   : > { %1597 = vmatprep.subr.bf16.mxu1 %v1760_v8 }
 0x608   : > { %1598 = vmatpush3.bf16.msra.mxu1 %v1673_v57 }
 0x609   : > { %1599 = vmatprep.subr.bf16.mxu1 %v1760_v8 }
 0x60c   : > { %1600 = vmatpush3.bf16.msra.mxu1 %v1674_v58 }
 0x60d   : > { %1601 = vmatprep.subr.bf16.mxu1 %v1760_v8 }
 0x610   : > { %1602 = vmatpush3.bf16.msra.mxu1 %v1675_v59 }
 0x6b3   : > { %v1137_v29 = vpop.f32.mrf.mxu1 }
 0x6b4   : > { %v1138_v30 = vadd.f32 %v1455_v28, %v1137_v29 }
 0x6b5   : > { %v1577_v31 = vpop.f32.mrf.mxu1 }
 0x6b6   : > { %v2008_v32 = vadd.f32 %v1138_v30, %v1900_v0  ;;  %v1667_v0 = vld [vmem:[%s2122_s9] sm:$0xff]  }
 0x6b7   : > { %v1140_v33 = vpop.f32.mrf.mxu1  ;;  %1582 = vmatpush3.bf16.msra.mxu0 %v1667_v0 }
 0x6b8   : > { %v1146_v34 = vsel %vm440_vm0, %v2008_v32, 0.0 }
 0x6b9   : > { %1147 = vadd.xlane.f32.xlu1 %v1146_v34  ;;  %v1578_v35 = vpop.f32.mrf.mxu1 }
 0x742   : > { %v1148_v36 = vpop.xlane.xlu1 %1147 }
 0x743   : > { %v1149_v37 = vmul.f32 0.03125, %v1148_v36 }
 0x745   : > { %v1150_v38 = vsub.f32 %v2008_v32, %v1149_v37 }
 0x747   : > { %v1151_v39 = vmul.f32 %v1150_v38, %v1150_v38 }
 0x749   : > { %v1152_v40 = vsel %vm440_vm0, %v1151_v39, 0.0 }
 0x74a   : > { %1153 = vadd.xlane.f32.xlu0 %v1152_v40 }
 0x7d3   : > { %v1154_v44 = vpop.xlane.xlu0 %1153 }
 0x7d4   : > { %v1155_v45 = vmul.f32 0.03125, %v1154_v44 }
 0x7d6   : > { %v1156_v46 = vadd.f32 1e-05, %v1155_v45 }
 0x7d8   : > { %1694 = vrsqrt.f32 %v1156_v46 }
 0x7e5   : > { %v1695_v47 = vpop.eup %1694 }
 0x7e6   : > { %v1158_v49 = vmul.f32 %v1695_v47, %v1150_v38 }
 0x7e8   : > { %v1165_v51 = vmul.f32 %v1459_v48, %v1158_v49 }
 0x7ea   : > { %v1172_v52 = vadd.f32 %v1460_v50, %v1165_v51 }
 0x7ec   : > { %v1173_v53 = vpack.c.bf16 %v1172_v52, %v1172_v52 }
 0x7ee   : > { %1584 = vmatmul.mubr.msk.bf16.vlgmr.msra.gmra.mxu0 %vm440_vm0, %v1173_v53 }
 0x8ae   : > { %v1234_v61 = vpop.f32.mrf.mxu0 }
 0x8af   : > { %v1235_v62 = vadd.f32 %v1461_v60, %v1234_v61 }
 0x8b0   : > { %v1585_v63 = vpop.f32.mrf.mxu0 }
 0x8b1   : > { %v1241_v1 = vmul.f32 0.70710677, %v1235_v62  ;;  %v1240_v8 = vmul.f32 0.5, %v1235_v62 }
 0x8b2   : > { %v1237_v2 = vpop.f32.mrf.mxu0 }
 0x8b3   : > { %1696 = verf.f32 %v1241_v1 }
 0x8b4   : > { %v1586_v3 = vpop.f32.mrf.mxu0 }
 0x8c0   : > { %v1697_v4 = vpop.eup %1696 }
 0x8c1   : > { %v1243_v5 = vadd.f32 1.0, %v1697_v4 }
 0x8c3   : > { %v1244_v6 = vmul.f32 %v1243_v5, %v1240_v8 }
 0x8c5   : > { %v1245_v7 = vpack.c.bf16 %v1244_v6, %v1244_v6 }
 0x8c7   : > { %1604 = vmatmul.mubr.bf16.vlgmr.msra.gmra.mxu1 %v1245_v7 }
 0x987   : > { %v1351_v10 = vpop.f32.mrf.mxu1 }
 0x988   : > { %v1352_v11 = vadd.f32 %v1465_v9, %v1351_v10 }
 0x989   : > { %v1605_v12 = vpop.f32.mrf.mxu1 }
 0x98a   : > { %v1357_v13 = vadd.f32 %v1352_v11, %v2008_v32 }
 0x98b   : > { %v1354_v14 = vpop.f32.mrf.mxu1 }
 0x98c   : > { %1358 = vst.msk [vmem:[%s431_s22] sm:$0xff] %vm440_vm0, %v1357_v13 }
 0x98d   : > { %v1606_v15 = vpop.f32.mrf.mxu1 }
 0x98e   : > { %1711 = shalt.err (!%p1708_p3)
}
 0x98f   : > { %s1712_s21 = scalar_lea.hbm %s2071_s1, 128  ;;  %s1716_s24 = scalar_lea.hbm %s2126_s13, 256 }
 0x990   : > { %p1713_p4 = scmp.ne.s32.totalorder %s2071_s1, %s1712_s21  ;;  %p1717_p9 = scmp.lt.s32.totalorder %s2071_s1, %s2126_s13 }
 0x991   : > { %p1718_p10 = scmp.lt.s32.totalorder %s1716_s24, %s1712_s21 }
 0x992   : > { %p1714_p7 = pnand %p1713_p4, %p1885_p5 }
 0x993   : > { %p1719_p11 = por %p1718_p10, %p1717_p9 }
 0x994   : > { %p1715_p8 = pneg %p1714_p7 }
 0x996   : > { %p1720_p12 = pnand %p1719_p11, %p1715_p8 }
 0x998   : > { %1723 = shalt.err (!%p1720_p12)
}
 0x999   : > { %1607 = dma.vmem_to_hbm [thread:$0]  (%p1885_p5), %s2073_s23, 128, %s2071_s1, %s1360_s29  }
 0x99a PF: > { %p1613_p13 = scmp.ge.s32.totalorder %s1758_s28, 2  ;;  %s1385_s15 = sand.u32 1, %s1746_s25  }
 0x99b   : > { %s1386_s2 = scalar_lea.sflag [#allocation8], %s1385_s15 }
 0x99c   : > { %p1610_p0 = pnand %p1613_p13, %p1889_p6 }
 0x99e   : > { %p1611_p1 = pneg %p1610_p0 }
 0x9a0   : > { %1741 = dma.done.wait (%p1611_p1), %s1386_s2, 128  }
 0x9a1   : > { %1743 = vsyncadd (%p1611_p1), %s1386_s2, 4294967168  ;;  %p23_p2 = scmp.ge.s32.totalorder %s1872_s14, 4   ;;  %s2135_s25 = smov %s1750_s26 }
 0x9a2   : > { %s2136_s26 = smov %s1754_s27  ;;  %s2137_s27 = smov %s1883_s17 }
 0x9a3   : > { %s2138_s28 = smov %s1872_s14  ;;  %25 = sbr.rel (!%p23_p2) target bundleno = 7 (0x7), region = 116 }
 0x9a8   :  { %1391 = vsyncpa [#allocation8], 1 }
 0x9a9   :  { %1393 = vsyncpa [#allocation8 + $0x1], 1 }

// kernel: tpu_custom_call.1
= control target key start
LH: loop header
LB: loop body
LE: loop exit
PB: predicated region body
PF: predicated region fallthrough
CT: control target
= control target key end

     0   :  { %s2113_s0 = inlined_call_operand.vmem [shape: f32[2,8,32], index: 0, kind: input, shape index: {}]   ;;  %s2114_s1 = inlined_call_operand.vmem [shape: f32[1,32], index: 1, kind: input, shape index: {}]   ;;  %s2115_s2 = inlined_call_operand.vmem [shape: f32[1,32], index: 2, kind: input, shape index: {}]   ;;  %s2116_s3 = inlined_call_operand.vmem [shape: bf16[32,96], index: 3, kind: input, shape index: {}]   ;;  %s2117_s4 = inlined_call_operand.vmem [shape: f32[1,96], index: 4, kind: input, shape index: {}]   ;;  %s2118_s5 = inlined_call_operand.vmem [shape: bf16[32,32], index: 5, kind: input, shape index: {}]   ;;  %s2119_s6 = inlined_call_operand.vmem [shape: f32[1,32], index: 6, kind: input, shape index: {}]   ;;  %s2120_s7 = inlined_call_operand.vmem [shape: f32[1,32], index: 7, kind: input, shape index: {}]   ;;  %s2121_s8 = inlined_call_operand.vmem [shape: f32[1,32], index: 8, kind: input, shape index: {}]   ;;  %s2122_s9 = inlined_call_operand.vmem [shape: bf16[32,128], index: 9, kind: input, shape index: {}]   ;;  %s2123_s10 = inlined_call_operand.vmem [shape: f32[1,128], index: 10, kind: input, shape index: {}]   ;;  %s2124_s11 = inlined_call_operand.vmem [shape: bf16[128,32], index: 11, kind: input, shape index: {}]   ;;  %s2125_s12 = inlined_call_operand.vmem [shape: f32[1,32], index: 12, kind: input, shape index: {}]   ;;  %s2126_s13 = inlined_call_operand.hbm [shape: f32[2,8,32], index: 13, kind: output, shape index: {}]  }
   0x1   :  { %2127 = sst [smem:[#allocation10_spill]] %s2113_s0 }
   0x2   :  { %2128 = sst [smem:[#allocation11_spill]] %s2114_s1 }
   0x3   :  { %2129 = sst [smem:[#allocation12_spill]] %s2115_s2 }
   0x4   :  { %18 = vsyncpa [#allocation8], 0 }
   0x5   :  { %20 = vsyncpa [#allocation8 + $0x1], 0  ;;  %s1847_s25 = smov 0   ;;  %s1849_s26 = smov 0  }
   0x6   :  { %s1851_s27 = smov 0   ;;  %s1853_s28 = smov 0  }
   0x7 LB: > { %s1868_s29 = sadd.s32 4294967295, %s1758_s28   ;;  %s1432_s30 = sadd.s32 4294967294, %s1758_s28   ;;  %s1758_s28 = sphi %s1853_s28, %s2138_s28   ;;  %s1754_s27 = sphi %s1851_s27, %s2137_s27   ;;  %s1750_s26 = sphi %s1849_s26, %s2136_s26   ;;  %s1746_s25 = sphi %s1847_s25, %s2135_s25  }
   0x8   : > { %s1872_s14 = sadd.s32 1, %s1758_s28   ;;  %s311_s15 = sadd.s32 1, %s1754_s27 }
   0x9   : > { %s308_s16 = ssub.s32 %s1758_s28, %s1872_s14  ;;  %p321_p0 = scmp.ne.s32.totalorder %s1754_s27, %s1750_s26 }
   0xa   : > { %p309_p1 = scmp.eq.s32.totalorder %s308_s16, 0  ;;  %p322_p2 = scmp.eq.s32.totalorder %s1868_s29, 1 }
   0xb   : > { %p327_p3 = scmp.ne.s32.totalorder %s1750_s26, %s1746_s25  ;;  %p328_p4 = scmp.eq.s32.totalorder %s1432_s30, 1 }
   0xc   : > { %s1883_s17 = scalar_select %p309_p1, %s1754_s27, %s311_s15  }
   0xd   : > { %p1885_p5 = por %p322_p2, %p321_p0  ;;  %p1889_p6 = por %p328_p4, %p327_p3 }
   0xe   : > { %p1435_p7 = scmp.ge.s32.totalorder %s1758_s28, 1  ;;  %p389_p8 = scmp.lt.s32.totalorder %s1758_s28, 3 }
  0x10   : > { %p390_p9 = pnand %p1435_p7, %p389_p8 }
  0x11   : > { %p432_p10 = scmp.lt.s32.totalorder (!%p390_p9), %s1868_s29, 1  ;;  %s2132_s0 = sld [smem:[#allocation10_spill]] (!%p390_p9) }
  0x12   : > { %393 = sbr.rel (%p390_p9) target bundleno = 2458 (0x99a), region = 72  ;;  %s2133_s1 = sld [smem:[#allocation11_spill]] (!%p390_p9) }
  0x13   : > { %s2134_s2 = sld [smem:[#allocation12_spill]] (!%p390_p9)  ;;  %s1762_s16 = smov (!%p390_p9), 80  }
  0x14   : > { %s1765_s22 = smov (!%p390_p9), 120   ;;  %s1766_s23 = smov (!%p390_p9), 72  }
  0x15   : > { %s1768_s30 = smov (!%p390_p9), 104   ;;  %s1769_s15 = smov (!%p390_p9), 64  }
  0x17   : > { %s433_s20 = scalar_select %p432_p10, %s1868_s29, 1  ;;  %vm440_vm0 = vcmask 261120   ;;  %v1662_v7 = vld [vmem:[%s2116_s3 + $0x8] sm:$0xff]   ;;  %v1760_v8 = vmov 0.0   ;;  %vm1761_vm1 = vmmov 0   ;;  %v1663_v9 = vld [vmem:[%s2116_s3] sm:$0xff]  }
  0x18   : > { %1515 = vmatprep.subr.bf16.mxu0 %v1760_v8  ;;  %1519 = vmatprep.mubr.msk.bf16.mxu0 %vm1761_vm1, %v1760_v8  ;;  %v1438_v14 = vld [vmem:[%s2133_s1] ss:$0 sm:$0xff]  ;;  %vm537_vm2 = vcmask 781312   ;;  %vm540_vm3 = vcmask 60416   ;;  %vm629_vm4 = vcmask 64512   ;;  %vm865_vm5 = vcmask 1043456  }
  0x19   : > { %s1437_s21 = sshll.u32 %s433_s20, 3  ;;  %1516 = vmatpush3.bf16.msra.mxu0 %v1662_v7  ;;  %1535 = vmatprep.subr.bf16.mxu1 %v1760_v8  ;;  %v1439_v16 = vld [vmem:[%s2134_s2] ss:$0 sm:$0xff]  ;;  %s1763_s20 = smov 96   ;;  %vm1058_vm6 = vcmask 126016   ;;  %vm1066_vm7 = vcmask 191616  }
  0x1a   : > { %s435_s24 = scalar_lea.vmem %s2132_s0, %s1437_s21  ;;  %1517 = vmatprep.subr.bf16.mxu0 %v1760_v8  ;;  %1537 = vmatprep.mubr.msk.bf16.mxu1 %vm1761_vm1, %v1760_v8  ;;  %v1440_v20 = vld [vmem:[%s2117_s4] ss:$0 sm:$0xff]  ;;  %s1764_s21 = smov 88   ;;  %vm1074_vm8 = vcmask 257216  }
  0x1b   : > { %v1900_v0 = vld [vmem:[%s435_s24] sm:$0xff]  ;;  %s1767_s24 = smov 112  }
  0x1c   : > { %v441_v1 = vsel %vm440_vm0, %v1900_v0, 0.0 }
  0x1d   : > { %442 = vadd.xlane.f32.xlu0 %v441_v1  ;;  %1518 = vmatpush3.bf16.msra.mxu0 %v1663_v9 }
  0x1e   : > { %1523 = vmatprep.subr.bf16.mxu0 %v1760_v8 }
  0xa6   : > { %v443_v2 = vpop.xlane.xlu0 %442 }
  0xa7   : > { %v445_v3 = vmul.f32 0.03125, %v443_v2 }
  0xa9   : > { %v446_v4 = vsub.f32 %v1900_v0, %v445_v3 }
  0xab   : > { %v447_v5 = vmul.f32 %v446_v4, %v446_v4 }
  0xad   : > { %v448_v6 = vsel %vm440_vm0, %v447_v5, 0.0 }
  0xae   : > { %449 = vadd.xlane.f32.xlu0 %v448_v6 }
 0x137   : > { %v450_v10 = vpop.xlane.xlu0 %449 }
 0x138   : > { %v451_v11 = vmul.f32 0.03125, %v450_v10 }
 0x13a   : > { %v452_v12 = vadd.f32 1e-05, %v451_v11 }
 0x13c   : > { %1676 = vrsqrt.f32 %v452_v12 }
 0x149   : > { %v1677_v13 = vpop.eup %1676 }
 0x14a   : > { %v454_v15 = vmul.f32 %v1677_v13, %v446_v4 }
 0x14c   : > { %v461_v17 = vmul.f32 %v1438_v14, %v454_v15 }
 0x14e   : > { %v468_v18 = vadd.f32 %v1439_v16, %v461_v17 }
 0x150   : > { %v469_v19 = vpack.c.bf16 %v468_v18, %v468_v18 }
 0x152   : > { %1520 = vmatmul.mubr.msk.bf16.vlgmr.msra.gmra.mxu0 %vm440_vm0, %v469_v19 }
 0x153   : > { %1525 = vmatprep.mubr.msk.bf16.mxu0 %vm1761_vm1, %v1760_v8 }
 0x212   : > { %v530_v21 = vpop.f32.mrf.mxu0 }
 0x213   : > { %v531_v22 = vadd.f32 %v1440_v20, %v530_v21 }
 0x214   : > { %v1521_v23 = vpop.f32.mrf.mxu0 }
 0x215   : > { %v536_v24 = vpack.c.bf16 %v531_v22, %v531_v22 }
 0x216   : > { %v533_v25 = vpop.f32.mrf.mxu0 }
 0x217   : > { %538 = vst.msk [vmem:[#allocation2] sm:$0xf] %vm537_vm2, %v536_v24 }
 0x218   : > { %v1522_v26 = vpop.f32.mrf.mxu0 }
 0x21e   : > { %v539_v27 = vld [vmem:[#allocation2] sm:$0xf] }
 0x21f   : > { %v582_v28 = vld [vmem:[#allocation2] sm:$0xf]  ;;  %541 = vst.msk [vmem:[#allocation3] sm:$0xf] %vm540_vm3, %v539_v27 }
 0x220   : > { %v542_v29 = vld [vmem:[#allocation2] sm:$0xf]  ;;  %584 = vrot.lane.b32.xlu0 %v582_v28, %s1762_s16  ;;  %s1770_s16 = smov 48  }
 0x221   : > { %544 = vrot.lane.b32.xlu1 %v542_v29, %s1763_s20  ;;  %v561_v30 = vld [vmem:[#allocation2] sm:$0xf]  ;;  %s1771_s20 = smov 40  }
 0x222   : > { %v554_v31 = vld [vmem:[#allocation2] sm:$0xf] }
 0x223   : > { %v603_v32 = vld [vmem:[#allocation2] sm:$0xf] }
 0x224   : > { %v575_v33 = vld [vmem:[#allocation2] sm:$0xf] }
 0x225   : > { %563 = vrot.lane.b32.xlu1 %v561_v30, %s1764_s21  ;;  %v596_v34 = vld [vmem:[#allocation2] sm:$0xf]  ;;  %s1772_s21 = smov 56  }
 0x226   : > { %v617_v46 = vld [vmem:[#allocation3] sm:$0xf]  ;;  %v548_v12 = vld [vmem:[#allocation2] sm:$0xf] }
 0x229   : > { %556 = vrot.lane.b32.xlu1 %v554_v31, %s1765_s22  ;;  %s1773_s22 = smov 16  }
 0x22d   : > { %605 = vrot.lane.b32.xlu1 %v603_v32, %s1766_s23 }
 0x231   : > { %577 = vrot.lane.b32.xlu1 %v575_v33, %s1767_s24 }
 0x235   : > { %598 = vrot.lane.b32.xlu1 %v596_v34, %s1768_s30  ;;  %s429_s30 = sand.u32 1, %s1750_s26  }
 0x292   : > { %v585_v35 = vpop.permute.xlu0 %584 }
 0x293   : > { %v545_v36 = vpop.permute.xlu1 %544  ;;  %588 = vst.msk [vmem:[#allocation4 + $0x8] sm:$0xf] %vm540_vm3, %v585_v35 }
 0x294   : > { %547 = vst.msk [vmem:[#allocation4] sm:$0xf] %vm540_vm3, %v545_v36  ;;  %v589_v36 = vld [vmem:[#allocation2] sm:$0xf] }
 0x297   : > { %v564_v37 = vpop.permute.xlu1 %563 }
 0x298   : > { %567 = vst.msk [vmem:[#allocation4 + $0x4] sm:$0xf] %vm540_vm3, %v564_v37  ;;  %v610_v37 = vld [vmem:[#allocation2] sm:$0xf] }
 0x29a   : > { %v623_v40 = vld [vmem:[#allocation4 + $0x8] sm:$0xf] }
 0x29b   : > { %v557_v38 = vpop.permute.xlu1 %556  ;;  %v621_v39 = vld [vmem:[#allocation4] sm:$0xf]  ;;  %v726_v42 = vsel %vm629_vm4, %v623_v40, 0 }
 0x29c   : > { %560 = vst.msk [vmem:[#allocation3 + $0x4] sm:$0xf] %vm540_vm3, %v557_v38  ;;  %v634_v41 = vsel %vm629_vm4, %v621_v39, 0  ;;  %1536 = vmatpush3.bf16.xpose.msra.mxu1 %v726_v42  ;;  %v568_v38 = vld [vmem:[#allocation2] sm:$0xf] }
 0x29d   : > { %1524 = vmatpush3.bf16.xpose.msra.mxu0 %v634_v41  ;;  %1547 = vmatprep.subr.bf16.mxu1 %v1760_v8 }
 0x29e   : > { %1529 = vmatprep.subr.bf16.mxu0 %v1760_v8 }
 0x29f   : > { %v606_v43 = vpop.permute.xlu1 %605  ;;  %v622_v44 = vld [vmem:[#allocation4 + $0x4] sm:$0xf] }
 0x2a0   : > { %609 = vst.msk [vmem:[#allocation4 + $0xc] sm:$0xf] %vm540_vm3, %v606_v43  ;;  %v680_v47 = vsel %vm629_vm4, %v622_v44, 0 }
 0x2a3   : > { %v578_v45 = vpop.permute.xlu1 %577  ;;  %v618_v50 = vld [vmem:[#allocation3 + $0x4] sm:$0xf] }
 0x2a4   : > { %581 = vst.msk [vmem:[#allocation3 + $0x8] sm:$0xf] %vm540_vm3, %v578_v45  ;;  %1526 = vmatmul.mubr.msk.bf16.vlgmr.msra.gmra.mxu0 %vm629_vm4, %v617_v46 }
 0x2a5   : > { %1530 = vmatpush3.bf16.xpose.msra.mxu0 %v680_v47  ;;  %1531 = vmatprep.mubr.msk.bf16.mxu0 %vm1761_vm1, %v1760_v8 }
 0x2a6   : > { %1541 = vmatprep.subr.bf16.mxu0 %v1760_v8 }
 0x2a7   : > { %v599_v48 = vpop.permute.xlu1 %598  ;;  %v624_v49 = vld [vmem:[#allocation4 + $0xc] sm:$0xf] }
 0x2a8   : > { %602 = vst.msk [vmem:[#allocation3 + $0xc] sm:$0xf] %vm540_vm3, %v599_v48  ;;  %v772_v52 = vsel %vm629_vm4, %v624_v49, 0 }
 0x2ab   : > { %v619_v51 = vld [vmem:[#allocation3 + $0x8] sm:$0xf] }
 0x2ac   : > { %1532 = vmatmul.mubr.msk.bf16.vlgmr.msra.gmra.mxu0 %vm629_vm4, %v618_v50  ;;  %1538 = vmatmul.mubr.msk.bf16.vlgmr.msra.gmra.mxu1 %vm629_vm4, %v619_v51 }
 0x2ad   : > { %1542 = vmatpush3.bf16.xpose.msra.mxu0 %v772_v52  ;;  %1543 = vmatprep.mubr.msk.bf16.mxu0 %vm1761_vm1, %v1760_v8 }
 0x2ae   : > { %1549 = vmatprep.mubr.msk.bf16.mxu1 %vm1761_vm1, %v1760_v8  ;;  %1553 = vmatprep.subr.bf16.mxu0 %v1760_v8 }
 0x2af   : > { %v620_v53 = vld [vmem:[#allocation3 + $0xc] sm:$0xf] }
 0x2b4   : > { %1544 = vmatmul.mubr.msk.bf16.vlgmr.msra.gmra.mxu0 %vm629_vm4, %v620_v53 }
 0x2b5   : > { %1555 = vmatprep.mubr.msk.bf16.mxu0 %vm1761_vm1, %v1760_v8 }
 0x364   : > { %v670_v54 = vpop.f32.mrf.mxu0 }
 0x365   : > { %v814_v55 = vsel %vm629_vm4, %v670_v54, -inf }
 0x366   : > { %815 = vmax.xlane.f32.xlu1 %v814_v55  ;;  %v1527_v56 = vpop.f32.mrf.mxu0 }
 0x368   : > { %v673_v57 = vpop.f32.mrf.mxu0 }
 0x36a   : > { %v1528_v58 = vpop.f32.mrf.mxu0 }
 0x36c   : > { %v716_v59 = vpop.f32.mrf.mxu0  ;;  %v762_v60 = vpop.f32.mrf.mxu1 }
 0x36d   : > { %v820_v61 = vsel %vm629_vm4, %v762_v60, -inf  ;;  %v817_v62 = vsel %vm629_vm4, %v716_v59, -inf }
 0x36e   : > { %v1539_v63 = vpop.f32.mrf.mxu1  ;;  %821 = vmax.xlane.f32.xlu1 %v820_v61  ;;  %818 = vmax.xlane.f32.xlu0 %v817_v62  ;;  %v1533_v1 = vpop.f32.mrf.mxu0 }
 0x370   : > { %v719_v2 = vpop.f32.mrf.mxu0  ;;  %v765_v3 = vpop.f32.mrf.mxu1 }
 0x372   : > { %v1534_v4 = vpop.f32.mrf.mxu0  ;;  %v1540_v5 = vpop.f32.mrf.mxu1 }
 0x374   : > { %v808_v6 = vpop.f32.mrf.mxu0 }
 0x375   : > { %v823_v7 = vsel %vm629_vm4, %v808_v6, -inf }
 0x376   : > { %824 = vmax.xlane.f32.xlu0 %v823_v7  ;;  %v1545_v9 = vpop.f32.mrf.mxu0 }
 0x378   : > { %v811_v10 = vpop.f32.mrf.mxu0 }
 0x37a   : > { %v1546_v11 = vpop.f32.mrf.mxu0 }
 0x37b   : > { %v1664_v11 = vld [vmem:[%s2118_s5 + $0x8] sm:$0xff]  }
 0x37f   : > { %550 = vrot.lane.b32.xlu1 %v548_v12, %s1769_s15  ;;  %s1436_s15 = sshll.u32 %s429_s30, 3 }
 0x3ef   : > { %v816_v13 = vpop.xlane.xlu1 %815 }
 0x3f0   : > { %v826_v14 = vsub.f32 %v670_v54, %v816_v13 }
 0x3f2   : > { %v830_v15 = vmul.f32 1.442695, %v826_v14  ;;  %v1665_v14 = vld [vmem:[%s2118_s5] sm:$0xff]  }
 0x3f4   : > { %1678 = vpow2.f32 %v830_v15 }
 0x3f7   : > { %v822_v16 = vpop.xlane.xlu1 %821  ;;  %v819_v17 = vpop.xlane.xlu0 %818 }
 0x3f8   : > { %v828_v18 = vsub.f32 %v762_v60, %v822_v16  ;;  %v827_v19 = vsub.f32 %v716_v59, %v819_v17 }
 0x3fa   : > { %v834_v20 = vmul.f32 1.442695, %v828_v18  ;;  %v832_v21 = vmul.f32 1.442695, %v827_v19 }
 0x3fb   : > { %v551_v22 = vpop.permute.xlu1 %550 }
 0x3fc   : > { %1680 = vpow2.f32 %v834_v20  ;;  %553 = vst.msk [vmem:[#allocation5] sm:$0xf] %vm540_vm3, %v551_v22 }
 0x3fd   : > { %1682 = vpow2.f32 %v832_v21 }
 0x3ff   : > { %v825_v23 = vpop.xlane.xlu0 %824 }
 0x400   : > { %v829_v24 = vsub.f32 %v808_v6, %v825_v23 }
 0x401   : > { %v1679_v25 = vpop.eup %1678 }
 0x402   : > { %v836_v26 = vmul.f32 1.442695, %v829_v24  ;;  %v838_v27 = vsel %vm629_vm4, %v1679_v25, 0.0 }
 0x403   : > { %839 = vadd.xlane.f32.xlu1 %v838_v27  ;;  %v625_v28 = vld [vmem:[#allocation5] sm:$0xf] }
 0x404   : > { %1684 = vpow2.f32 %v836_v26  ;;  %v867_v29 = vsel %vm865_vm5, %v625_v28, 0  ;;  %v1455_v28 = vld [vmem:[%s2119_s6] ss:$0 sm:$0xff] }
 0x405   : > { %1548 = vmatpush3.bf16.msra.mxu1 %v867_v29 }
 0x406   : > { %1559 = vmatprep.subr.bf16.mxu1 %v1760_v8 }
 0x409   : > { %v1681_v30 = vpop.eup %1680 }
 0x40a   : > { %v1683_v31 = vpop.eup %1682  ;;  %v844_v32 = vsel %vm629_vm4, %v1681_v30, 0.0 }
 0x40b   : > { %845 = vadd.xlane.f32.xlu1 %v844_v32  ;;  %v841_v33 = vsel %vm629_vm4, %v1683_v31, 0.0 }
 0x40c   : > { %842 = vadd.xlane.f32.xlu0 %v841_v33 }
 0x411   : > { %v1685_v34 = vpop.eup %1684 }
 0x412   : > { %v847_v35 = vsel %vm629_vm4, %v1685_v34, 0.0 }
 0x413   : > { %848 = vadd.xlane.f32.xlu0 %v847_v35 }
 0x41c   : > { %591 = vrot.lane.b32.xlu1 %v589_v36, %s1770_s16  ;;  %s1774_s16 = smov 8  }
 0x420   : > { %612 = vrot.lane.b32.xlu1 %v610_v37, %s1771_s20  ;;  %s1775_s20 = smov 24  }
 0x429   : > { %570 = vrot.lane.b32.xlu0 %v568_v38, %s1772_s21  ;;  %s1475_s21 = sshll.u32 %s1868_s29, 7  ;;  %s1360_s29 = scalar_lea.sflag [#allocation8], %s429_s30 }
 0x42a   : > { %s2071_s1 = scalar_lea.hbm %s2126_s13, %s1475_s21 }
 0x48c   : > { %v840_v39 = vpop.xlane.xlu1 %839 }
 0x48d   : > { %1686 = vrcp.f32 %v840_v39 }
 0x494   : > { %v846_v40 = vpop.xlane.xlu1 %845 }
 0x495   : > { %1688 = vrcp.f32 %v846_v40  ;;  %v843_v41 = vpop.xlane.xlu0 %842 }
 0x496   : > { %1690 = vrcp.f32 %v843_v41  ;;  %v1666_v41 = vld [vmem:[%s2122_s9 + $0x8] sm:$0xff]  }
 0x498   : > { %v592_v42 = vpop.permute.xlu1 %591 }
 0x499   : > { %595 = vst.msk [vmem:[#allocation5 + $0x8] sm:$0xf] %vm540_vm3, %v592_v42  ;;  %v1668_v42 = vld [vmem:[%s2124_s11 + $0x38] sm:$0xff]  }
 0x49a   : > { %v1687_v43 = vpop.eup %1686 }
 0x49b   : > { %v854_v44 = vmul.f32 %v1687_v43, %v1679_v25  ;;  %v1669_v43 = vld [vmem:[%s2124_s11 + $0x30] sm:$0xff]  }
 0x49c   : > { %v613_v45 = vpop.permute.xlu1 %612  ;;  %v849_v46 = vpop.xlane.xlu0 %848 }
 0x49d   : > { %616 = vst.msk [vmem:[#allocation5 + $0xc] sm:$0xf] %vm540_vm3, %v613_v45  ;;  %v858_v47 = vpack.c.bf16 %v854_v44, %v854_v44  ;;  %1692 = vrcp.f32 %v849_v46 }
 0x49f   : > { %1550 = vmatmul.mubr.msk.bf16.vlgmr.msra.gmra.mxu1 %vm629_vm4, %v858_v47 }
 0x4a0   : > { %v571_v48 = vpop.permute.xlu0 %570  ;;  %v627_v49 = vld [vmem:[#allocation5 + $0x8] sm:$0xf]  ;;  %1561 = vmatprep.mubr.msk.bf16.mxu1 %vm1761_vm1, %v1760_v8 }
 0x4a1   : > { %574 = vst.msk [vmem:[#allocation5 + $0x4] sm:$0xf] %vm540_vm3, %v571_v48  ;;  %v959_v50 = vsel %vm865_vm5, %v627_v49, 0  ;;  %v1459_v48 = vld [vmem:[%s2120_s7] ss:$0 sm:$0xff] }
 0x4a2   : > { %v1689_v51 = vpop.eup %1688  ;;  %1560 = vmatpush3.bf16.msra.mxu1 %v959_v50  ;;  %v1460_v50 = vld [vmem:[%s2121_s8] ss:$0 sm:$0xff] }
 0x4a3   : > { %v856_v52 = vmul.f32 %v1689_v51, %v1681_v30  ;;  %1571 = vmatprep.subr.bf16.mxu1 %v1760_v8  ;;  %v1691_v53 = vpop.eup %1690 }
 0x4a4   : > { %v855_v55 = vmul.f32 %v1691_v53, %v1683_v31  ;;  %v628_v58 = vld [vmem:[#allocation5 + $0xc] sm:$0xf] }
 0x4a5   : > { %v860_v54 = vpack.c.bf16 %v856_v52, %v856_v52  ;;  %v1005_v61 = vsel %vm865_vm5, %v628_v58, 0  ;;  %v1674_v58 = vld [vmem:[%s2124_s11 + $0x8] sm:$0xff]  }
 0x4a6   : > { %v859_v59 = vpack.c.bf16 %v855_v55, %v855_v55  ;;  %v1671_v55 = vld [vmem:[%s2124_s11 + $0x20] sm:$0xff]  }
 0x4a7   : > { %1562 = vmatmul.mubr.msk.bf16.vlgmr.msra.gmra.mxu1 %vm629_vm4, %v860_v54  ;;  %v1670_v54 = vld [vmem:[%s2124_s11 + $0x28] sm:$0xff]  }
 0x4a8   : > { %v626_v56 = vld [vmem:[#allocation5 + $0x4] sm:$0xf]  ;;  %1575 = vmatprep.mubr.msk.bf16.mxu1 %vm1761_vm1, %v1760_v8  ;;  %1572 = vmatpush3.bf16.msra.mxu1 %v1664_v11 }
 0x4a9   : > { %v913_v57 = vsel %vm865_vm5, %v626_v56, 0  ;;  %1573 = vmatprep.subr.bf16.mxu1 %v1760_v8  ;;  %v1672_v56 = vld [vmem:[%s2124_s11 + $0x18] sm:$0xff]  }
 0x4aa   : > { %1554 = vmatpush3.bf16.msra.mxu0 %v913_v57  ;;  %v1693_v60 = vpop.eup %1692  ;;  %v1673_v57 = vld [vmem:[%s2124_s11 + $0x10] sm:$0xff]  }
 0x4ab   : > { %1565 = vmatprep.subr.bf16.mxu0 %v1760_v8  ;;  %v857_v62 = vmul.f32 %v1693_v60, %v1685_v34  ;;  %v1461_v60 = vld [vmem:[%s2123_s10] ss:$0 sm:$0xff] }
 0x4ac   : > { %1574 = vmatpush3.bf16.msra.mxu1 %v1665_v14 }
 0x4ad   : > { %1556 = vmatmul.mubr.msk.bf16.vlgmr.msra.gmra.mxu0 %vm629_vm4, %v859_v59  ;;  %v861_v63 = vpack.c.bf16 %v857_v62, %v857_v62  ;;  %1587 = vmatprep.subr.bf16.mxu1 %v1760_v8  ;;  %v1675_v59 = vld [vmem:[%s2124_s11] sm:$0xff]  }
 0x4ae   : > { %1566 = vmatpush3.bf16.msra.mxu0 %v1005_v61  ;;  %1567 = vmatprep.mubr.msk.bf16.mxu0 %vm1761_vm1, %v1760_v8 }
 0x4af   : > { %1579 = vmatprep.subr.bf16.mxu0 %v1760_v8 }
 0x4b5   : > { %1568 = vmatmul.mubr.msk.bf16.vlgmr.msra.gmra.mxu0 %vm629_vm4, %v861_v63 }
 0x4b6   : > { %1583 = vmatprep.mubr.msk.bf16.mxu0 %vm1761_vm1, %v1760_v8  ;;  %1580 = vmatpush3.bf16.msra.mxu0 %v1666_v41 }
 0x4b7   : > { %1581 = vmatprep.subr.bf16.mxu0 %v1760_v8 }
 0x55f   : > { %v903_v1 = vpop.f32.mrf.mxu1 }
 0x560   : > { %v1047_v2 = vpack.c.bf16 %v903_v1, %v903_v1 }
 0x561   : > { %v1551_v3 = vpop.f32.mrf.mxu1 }
 0x562   : > { %1051 = vst.msk [vmem:[#allocation6] sm:$0xf] %vm540_vm3, %v1047_v2 }
 0x563   : > { %v906_v4 = vpop.f32.mrf.mxu1 }
 0x565   : > { %v1552_v5 = vpop.f32.mrf.mxu1 }
 0x567   : > { %v995_v6 = vpop.f32.mrf.mxu1 }
 0x568   : > { %v1479_v7 = vpack.c.bf16 %v995_v6, %v995_v6 }
 0x569   : > { %v1563_v9 = vpop.f32.mrf.mxu1 }
 0x56a   : > { %1063 = vrot.lane.b32.xlu1 %v1479_v7, %s1773_s22  ;;  %v1465_v9 = vld [vmem:[%s2125_s12] ss:$0 sm:$0xff]  ;;  %s431_s22 = scalar_lea.vmem [#allocation7], %s1436_s15 }
 0x56b   : > { %v998_v10 = vpop.f32.mrf.mxu1  ;;  %s1373_s23 = sshll.u32 %s431_s22, 4  ;;  %s2073_s23 = int_to_ptr.vmem [resolvable:$true] %s1373_s23 }
 0x56c   : > { %s1698_s15 = scalar_lea.vmem %s2073_s23, 128 }
 0x56d   : > { %v949_v12 = vpop.f32.mrf.mxu0  ;;  %v1564_v13 = vpop.f32.mrf.mxu1  ;;  %p1699_p11 = scmp.ne.s32.totalorder %s2073_s23, %s1698_s15 }
 0x56e   : > { %v1478_v15 = vpack.c.bf16 %v949_v12, %v949_v12 }
 0x56f   : > { %v1557_v16 = vpop.f32.mrf.mxu0  ;;  %p1700_p12 = pnand %p1699_p11, %p1885_p5 }
 0x570   : > { %1055 = vrot.lane.b32.xlu0 %v1478_v15, %s1774_s16  ;;  %s1776_s16 = smov [#allocation7]  }
 0x571   : > { %v952_v17 = vpop.f32.mrf.mxu0  ;;  %p1701_p13 = pneg %p1700_p12 }
 0x573   : > { %v1558_v18 = vpop.f32.mrf.mxu0 }
 0x575   : > { %v1041_v19 = vpop.f32.mrf.mxu0 }
 0x576   : > { %v1480_v20 = vpack.c.bf16 %v1041_v19, %v1041_v19 }
 0x577   : > { %v1569_v21 = vpop.f32.mrf.mxu0 }
 0x578   : > { %1071 = vrot.lane.b32.xlu0 %v1480_v20, %s1775_s20  ;;  %s1702_s20 = sshll.u32 %s1776_s16, 4  ;;  %s1703_s20 = int_to_ptr.vmem [resolvable:$false] %s1702_s20 }
 0x579   : > { %v1044_v22 = vpop.f32.mrf.mxu0  ;;  %s1704_s0 = scalar_lea.vmem %s1703_s20, 256  ;;  %p1705_p0 = scmp.lt.s32.totalorder %s2073_s23, %s1703_s20 }
 0x57a   : > { %p1706_p1 = scmp.lt.s32.totalorder %s1704_s0, %s1698_s15 }
 0x57b   : > { %v1570_v23 = vpop.f32.mrf.mxu0 }
 0x57c   : > { %p1707_p2 = por %p1706_p1, %p1705_p0 }
 0x57e   : > { %p1708_p3 = pnand %p1707_p2, %p1701_p13 }
 0x5dc   : > { %v1064_v25 = vpop.permute.xlu1 %1063 }
 0x5e2   : > { %v1056_v24 = vpop.permute.xlu0 %1055 }
 0x5e3   : > { %1059 = vst.msk [vmem:[#allocation6] sm:$0xf] %vm1058_vm6, %v1056_v24 }
 0x5e4   : > { %1067 = vst.msk [vmem:[#allocation6] sm:$0xf] %vm1066_vm7, %v1064_v25 }
 0x5ea   : > { %v1072_v26 = vpop.permute.xlu0 %1071 }
 0x5eb   : > { %1075 = vst.msk [vmem:[#allocation6] sm:$0xf] %vm1074_vm8, %v1072_v26 }
 0x5f2   : > { %v1076_v27 = vld [vmem:[#allocation6] sm:$0xf] }
 0x5f3   : > { %1576 = vmatmul.mubr.msk.bf16.vlgmr.msra.gmra.mxu1 %vm440_vm0, %v1076_v27 }
 0x5f4   : > { %1603 = vmatprep.mubr.msk.bf16.mxu1 %vm1761_vm1, %v1760_v8  ;;  %1588 = vmatpush3.bf16.msra.mxu1 %v1668_v42 }
 0x5f5   : > { %1589 = vmatprep.subr.bf16.mxu1 %v1760_v8 }
 0x5f8   : > { %1590 = vmatpush3.bf16.msra.mxu1 %v1669_v43 }
 0x5f9   : > { %1591 = vmatprep.subr.bf16.mxu1 %v1760_v8 }
 0x5fc   : > { %1592 = vmatpush3.bf16.msra.mxu1 %v1670_v54 }
 0x5fd   : > { %1593 = vmatprep.subr.bf16.mxu1 %v1760_v8 }
 0x600   : > { %1594 = vmatpush3.bf16.msra.mxu1 %v1671_v55 }
 0x601   : > { %1595 = vmatprep.subr.bf16.mxu1 %v1760_v8 }
 0x604   : > { %1596 = vmatpush3.bf16.msra.mxu1 %v1672_v56 }
 0x605   : > { %1597 = vmatprep.subr.bf16.mxu1 %v1760_v8 }
 0x608   : > { %1598 = vmatpush3.bf16.msra.mxu1 %v1673_v57 }
 0x609   : > { %1599 = vmatprep.subr.bf16.mxu1 %v1760_v8 }
 0x60c   : > { %1600 = vmatpush3.bf16.msra.mxu1 %v1674_v58 }
 0x60d   : > { %1601 = vmatprep.subr.bf16.mxu1 %v1760_v8 }
 0x610   : > { %1602 = vmatpush3.bf16.msra.mxu1 %v1675_v59 }
 0x6b3   : > { %v1137_v29 = vpop.f32.mrf.mxu1 }
 0x6b4   : > { %v1138_v30 = vadd.f32 %v1455_v28, %v1137_v29 }
 0x6b5   : > { %v1577_v31 = vpop.f32.mrf.mxu1 }
 0x6b6   : > { %v2008_v32 = vadd.f32 %v1138_v30, %v1900_v0  ;;  %v1667_v0 = vld [vmem:[%s2122_s9] sm:$0xff]  }
 0x6b7   : > { %v1140_v33 = vpop.f32.mrf.mxu1  ;;  %1582 = vmatpush3.bf16.msra.mxu0 %v1667_v0 }
 0x6b8   : > { %v1146_v34 = vsel %vm440_vm0, %v2008_v32, 0.0 }
 0x6b9   : > { %1147 = vadd.xlane.f32.xlu1 %v1146_v34  ;;  %v1578_v35 = vpop.f32.mrf.mxu1 }
 0x742   : > { %v1148_v36 = vpop.xlane.xlu1 %1147 }
 0x743   : > { %v1149_v37 = vmul.f32 0.03125, %v1148_v36 }
 0x745   : > { %v1150_v38 = vsub.f32 %v2008_v32, %v1149_v37 }
 0x747   : > { %v1151_v39 = vmul.f32 %v1150_v38, %v1150_v38 }
 0x749   : > { %v1152_v40 = vsel %vm440_vm0, %v1151_v39, 0.0 }
 0x74a   : > { %1153 = vadd.xlane.f32.xlu0 %v1152_v40 }
 0x7d3   : > { %v1154_v44 = vpop.xlane.xlu0 %1153 }
 0x7d4   : > { %v1155_v45 = vmul.f32 0.03125, %v1154_v44 }
 0x7d6   : > { %v1156_v46 = vadd.f32 1e-05, %v1155_v45 }
 0x7d8   : > { %1694 = vrsqrt.f32 %v1156_v46 }
 0x7e5   : > { %v1695_v47 = vpop.eup %1694 }
 0x7e6   : > { %v1158_v49 = vmul.f32 %v1695_v47, %v1150_v38 }
 0x7e8   : > { %v1165_v51 = vmul.f32 %v1459_v48, %v1158_v49 }
 0x7ea   : > { %v1172_v52 = vadd.f32 %v1460_v50, %v1165_v51 }
 0x7ec   : > { %v1173_v53 = vpack.c.bf16 %v1172_v52, %v1172_v52 }
 0x7ee   : > { %1584 = vmatmul.mubr.msk.bf16.vlgmr.msra.gmra.mxu0 %vm440_vm0, %v1173_v53 }
 0x8ae   : > { %v1234_v61 = vpop.f32.mrf.mxu0 }
 0x8af   : > { %v1235_v62 = vadd.f32 %v1461_v60, %v1234_v61 }
 0x8b0   : > { %v1585_v63 = vpop.f32.mrf.mxu0 }
 0x8b1   : > { %v1241_v1 = vmul.f32 0.70710677, %v1235_v62  ;;  %v1240_v8 = vmul.f32 0.5, %v1235_v62 }
 0x8b2   : > { %v1237_v2 = vpop.f32.mrf.mxu0 }
 0x8b3   : > { %1696 = verf.f32 %v1241_v1 }
 0x8b4   : > { %v1586_v3 = vpop.f32.mrf.mxu0 }
 0x8c0   : > { %v1697_v4 = vpop.eup %1696 }
 0x8c1   : > { %v1243_v5 = vadd.f32 1.0, %v1697_v4 }
 0x8c3   : > { %v1244_v6 = vmul.f32 %v1243_v5, %v1240_v8 }
 0x8c5   : > { %v1245_v7 = vpack.c.bf16 %v1244_v6, %v1244_v6 }
 0x8c7   : > { %1604 = vmatmul.mubr.bf16.vlgmr.msra.gmra.mxu1 %v1245_v7 }
 0x987   : > { %v1351_v10 = vpop.f32.mrf.mxu1 }
 0x988   : > { %v1352_v11 = vadd.f32 %v1465_v9, %v1351_v10 }
 0x989   : > { %v1605_v12 = vpop.f32.mrf.mxu1 }
 0x98a   : > { %v1357_v13 = vadd.f32 %v1352_v11, %v2008_v32 }
 0x98b   : > { %v1354_v14 = vpop.f32.mrf.mxu1 }
 0x98c   : > { %1358 = vst.msk [vmem:[%s431_s22] sm:$0xff] %vm440_vm0, %v1357_v13 }
 0x98d   : > { %v1606_v15 = vpop.f32.mrf.mxu1 }
 0x98e   : > { %1711 = shalt.err (!%p1708_p3)
}
 0x98f   : > { %s1712_s21 = scalar_lea.hbm %s2071_s1, 128  ;;  %s1716_s24 = scalar_lea.hbm %s2126_s13, 256 }
 0x990   : > { %p1713_p4 = scmp.ne.s32.totalorder %s2071_s1, %s1712_s21  ;;  %p1717_p9 = scmp.lt.s32.totalorder %s2071_s1, %s2126_s13 }
 0x991   : > { %p1718_p10 = scmp.lt.s32.totalorder %s1716_s24, %s1712_s21 }
 0x992   : > { %p1714_p7 = pnand %p1713_p4, %p1885_p5 }
 0x993   : > { %p1719_p11 = por %p1718_p10, %p1717_p9 }
 0x994   : > { %p1715_p8 = pneg %p1714_p7 }
 0x996   : > { %p1720_p12 = pnand %p1719_p11, %p1715_p8 }
 0x998   : > { %1723 = shalt.err (!%p1720_p12)
}
 0x999   : > { %1607 = dma.vmem_to_hbm [thread:$0]  (%p1885_p5), %s2073_s23, 128, %s2071_s1, %s1360_s29  }
 0x99a PF: > { %p1613_p13 = scmp.ge.s32.totalorder %s1758_s28, 2  ;;  %s1385_s15 = sand.u32 1, %s1746_s25  }
 0x99b   : > { %s1386_s2 = scalar_lea.sflag [#allocation8], %s1385_s15 }
 0x99c   : > { %p1610_p0 = pnand %p1613_p13, %p1889_p6 }
 0x99e   : > { %p1611_p1 = pneg %p1610_p0 }
 0x9a0   : > { %1741 = dma.done.wait (%p1611_p1), %s1386_s2, 128  }
 0x9a1   : > { %1743 = vsyncadd (%p1611_p1), %s1386_s2, 4294967168  ;;  %p23_p2 = scmp.ge.s32.totalorder %s1872_s14, 4   ;;  %s2135_s25 = smov %s1750_s26 }
 0x9a2   : > { %s2136_s26 = smov %s1754_s27  ;;  %s2137_s27 = smov %s1883_s17 }
 0x9a3   : > { %s2138_s28 = smov %s1872_s14  ;;  %25 = sbr.rel (!%p23_p2) target bundleno = 7 (0x7), region = 116 }
 0x9a8   :  { %1391 = vsyncpa [#allocation8], 1 }
 0x9a9   :  { %1393 = vsyncpa [#allocation8 + $0x1], 1 }

</bundles_post_ra>
